<compile_context>
chip_gen: v7x
topology: tpu7x:2x2x1
jax: 0.10.0
libtpu: 0.0.40
codegen_flags: <defaults>
</compile_context>

<pallas_src>
import functools

import jax
import jax.numpy as jnp
from jax.experimental import pallas as pl
from jax.experimental.pallas import tpu as pltpu


def _rope_cache_kernel(inv_freq_ref, cos_ref, sin_ref, *, tile_s):
    # inv_freq_ref: (1, dim)        -- pre-duplicated concat(inv_freq, inv_freq)
    # cos_ref:      (tile_s, dim)
    # sin_ref:      (tile_s, dim)
    i = pl.program_id(0)
    dim = inv_freq_ref.shape[-1]
    # Absolute positions for the rows of this block (exact up to 2^24 after
    # the f32 cast, plenty for any realistic cache length).
    t = (i * tile_s
         + jax.lax.broadcasted_iota(jnp.int32, (tile_s, dim), 0)
         ).astype(jnp.float32)
    freqs = t * inv_freq_ref[...]          # (tile_s, dim) via sublane broadcast
    cos_ref[...] = jnp.cos(freqs).astype(cos_ref.dtype)
    sin_ref[...] = jnp.sin(freqs).astype(sin_ref.dtype)


def _choose_tile(seq_len):
    # Multiple of 16 so both f32 (8-sublane) and bf16 (16-sublane packed)
    # output tiles are layout friendly.
    padded = max(16, ((seq_len + 15) // 16) * 16)
    if padded <= 4096:
        # Single grid step: one launch, no per-step pipeline overhead.
        return padded
    # Long caches: 2048-row tiles (~1 MiB per output @ dim=128 f32) keep the
    # double-buffered footprint small on every generation and leave >=2 grid
    # steps so v7x's second TensorCore can take half the work.
    return 2048


@functools.partial(jax.jit,
                   static_argnames=("seq_len_padded", "dim", "tile_s",
                                    "out_dtype"))
def _build_rope_cache(inv_freq_full, seq_len_padded, dim, tile_s, out_dtype):
    """Build cos/sin caches, each of shape (seq_len_padded, dim)."""
    grid = (seq_len_padded // tile_s,)
    cos, sin = pl.pallas_call(
        functools.partial(_rope_cache_kernel, tile_s=tile_s),
        out_shape=(jax.ShapeDtypeStruct((seq_len_padded, dim), out_dtype),
                   jax.ShapeDtypeStruct((seq_len_padded, dim), out_dtype)),
        grid_spec=pltpu.PrefetchScalarGridSpec(
            num_scalar_prefetch=0,
            grid=grid,
            in_specs=[pl.BlockSpec((1, dim), lambda i: (0, 0))],
            out_specs=[pl.BlockSpec((tile_s, dim), lambda i: (i, 0)),
                       pl.BlockSpec((tile_s, dim), lambda i: (i, 0))],
        ),
        compiler_params=pltpu.CompilerParams(
            # No-op on 1-TC chips; shards the grid across v7x's 2 TensorCores
            # when there is more than one step.
            dimension_semantics=("parallel",),
            # Explicit headroom: worst-case buffers are ~8 MiB (f32 dim=128,
            # tile_s=4096, 2 outputs double-buffered), safe on every gen.
            vmem_limit_bytes=32 * 1024 * 1024,
        ),
    )(inv_freq_full.reshape(1, dim).astype(jnp.float32))
    return cos, sin


class Qwen2RotaryEmbeddingPallas:
    """JAX/Pallas port of Qwen2RotaryEmbedding."""

    def __init__(self, dim, max_position_embeddings=2048, base=10000.0,
                 cache_dtype=jnp.float32):
        self.dim = dim
        self.max_position_embeddings = max_position_embeddings
        self.base = float(base)
        self.cache_dtype = jnp.dtype(cache_dtype)
        # inv_freq = 1 / base^(arange(0, dim, 2)/dim), shape (dim//2,)
        # (matches the PyTorch formula exactly)
        self.inv_freq = 1.0 / (
            self.base ** (jnp.arange(0, dim, 2, dtype=jnp.float32) / dim))
        # Pre-duplicated (dim,) row = concat(inv_freq, inv_freq): the kernel
        # computes at full lane width with no in-kernel concat.
        self._inv_freq_full = jnp.concatenate([self.inv_freq, self.inv_freq])
        self._slice_cache = {}
        self._set_cos_sin_cache(max_position_embeddings)

    def _set_cos_sin_cache(self, seq_len):
        self.max_seq_len_cached = seq_len
        tile_s = _choose_tile(seq_len)
        seq_pad = pl.cdiv(seq_len, tile_s) * tile_s
        cos, sin = _build_rope_cache(self._inv_freq_full, seq_pad, self.dim,
                                     tile_s, self.cache_dtype)
        # Drop padding rows (no-op when seq_pad == seq_len).
        self.cos_cached = cos if seq_pad == seq_len else cos[:seq_len]
        self.sin_cached = sin if seq_pad == seq_len else sin[:seq_len]
        self._slice_cache = {}

    def __call__(self, x, seq_len=None):
        if seq_len is None:
            seq_len = x.shape[-2]
        seq_len = int(seq_len)
        if seq_len > self.max_seq_len_cached:
            self._set_cos_sin_cache(seq_len)
        key = (seq_len, jnp.dtype(x.dtype))
        hit = self._slice_cache.get(key)
        if hit is None:
            hit = (self.cos_cached[:seq_len].astype(x.dtype),
                   self.sin_cached[:seq_len].astype(x.dtype))
            self._slice_cache[key] = hit
        return hit


if __name__ == "__main__":
    # Small, deterministic example shapes:
    #   head dim = 32, max cache length = 128, query seq_len = 8
    dim = 32
    max_pos = 128
    seq_len = 8
    batch, heads = 2, 4

    key = jax.random.PRNGKey(0)
    # x is only used for its dtype / seq context in the original forward
    x = jax.random.normal(key, (batch, heads, seq_len, dim), dtype=jnp.float32)

    rope = Qwen2RotaryEmbeddingPallas(dim, max_position_embeddings=max_pos,
                                      base=10000.0)
    cos, sin = rope(x, seq_len=seq_len)
    cos = jax.block_until_ready(cos)
    sin = jax.block_until_ready(sin)

    # Second call exercises the memoized (seq_len, dtype) path.
    cos2, sin2 = rope(x)  # seq_len derived from x.shape[-2]
    cos2 = jax.block_until_ready(cos2)

    # Growing past the cached length rebuilds the cache (PyTorch semantics).
    cos3, sin3 = rope(x, seq_len=max_pos + 40)
    cos3 = jax.block_until_ready(cos3)

    # Reference check against plain JAX (mirrors the PyTorch math exactly).
    t = jnp.arange(max_pos + 40, dtype=jnp.float32)
    freqs = jnp.outer(t, rope.inv_freq)
    emb = jnp.concatenate([freqs, freqs], axis=-1)
    cos_full = jnp.cos(emb).astype(x.dtype)
    sin_full = jnp.sin(emb).astype(x.dtype)
    cos_ref, sin_ref = cos_full[:seq_len], sin_full[:seq_len]

    assert cos.shape == (seq_len, dim) and sin.shape == (seq_len, dim)
    assert cos.dtype == x.dtype and sin.dtype == x.dtype
    assert jnp.allclose(cos, cos_ref, atol=1e-5, rtol=1e-5)
    assert jnp.allclose(sin, sin_ref, atol=1e-5, rtol=1e-5)
    assert jnp.allclose(cos2, cos_ref, atol=1e-5, rtol=1e-5)
    assert jnp.allclose(sin2, sin_ref, atol=1e-5, rtol=1e-5)
    assert cos3.shape == (max_pos + 40, dim)
    assert jnp.allclose(cos3, cos_full, atol=1e-5, rtol=1e-5)
    assert jnp.allclose(sin3, sin_full, atol=1e-5, rtol=1e-5)

    print("KERNEL_OK")
</pallas_src>

<mosaic_0001>
module attributes {stable_mosaic.version = 11 : i64} {
  func.func @_rope_cache_kernel(%arg0: i32, %arg1: memref<1x32xf32, #tpu.memory_space<vmem>>, %arg2: memref<128x32xf32, #tpu.memory_space<vmem>>, %arg3: memref<128x32xf32, #tpu.memory_space<vmem>>) attributes {dimension_semantics = [#tpu.dimension_semantics<parallel>], iteration_bounds = array<i64: 1>, scalar_prefetch = 0 : i64, scratch_operands = 0 : i64, tpu.core_type = #tpu.core_type<tc>, window_params = [{pipeline_mode = #tpu.pipeline_mode<synchronous>, transform_indices = @transform_0, window_bounds = array<i64: 1, 32>}, {transform_indices = @transform_1, window_bounds = array<i64: 128, 32>}, {transform_indices = @transform_2, window_bounds = array<i64: 128, 32>}]} {
    %c128_i32 = arith.constant 128 : i32
    %0 = arith.muli %arg0, %c128_i32 : i32
    %1 = tpu.iota {dimensions = array<i32: 0>} : vector<128x32xi32>
    %2 = vector.broadcast %0 : i32 to vector<128x32xi32>
    %3 = arith.addi %2, %1 : vector<128x32xi32>
    %4 = arith.sitofp %3 : vector<128x32xi32> to vector<128x32xf32>
    %c0 = arith.constant 0 : index
    %c0_0 = arith.constant 0 : index
    %5 = vector.load %arg1[%c0, %c0_0] : memref<1x32xf32, #tpu.memory_space<vmem>>, vector<1x32xf32>
    %6 = vector.broadcast %5 : vector<1x32xf32> to vector<128x32xf32>
    %7 = arith.mulf %4, %6 : vector<128x32xf32>
    %8 = math.cos %7 : vector<128x32xf32>
    %c0_1 = arith.constant 0 : index
    %c0_2 = arith.constant 0 : index
    %9 = vector.load %arg2[%c0_1, %c0_2] : memref<128x32xf32, #tpu.memory_space<vmem>>, vector<128x32xf32>
    tpu.vector_store %arg2[%c0_1, %c0_2], %8 {strides = array<i32>} : memref<128x32xf32, #tpu.memory_space<vmem>>, vector<128x32xf32>,
    %10 = math.sin %7 : vector<128x32xf32>
    %c0_3 = arith.constant 0 : index
    %c0_4 = arith.constant 0 : index
    %11 = vector.load %arg3[%c0_3, %c0_4] : memref<128x32xf32, #tpu.memory_space<vmem>>, vector<128x32xf32>
    tpu.vector_store %arg3[%c0_3, %c0_4], %10 {strides = array<i32>} : memref<128x32xf32, #tpu.memory_space<vmem>>, vector<128x32xf32>,
    return
  }
  func.func @transform_0(%arg0: i32) -> (i32, i32) {
    %c0_i32 = arith.constant 0 : i32
    %c0_i32_0 = arith.constant 0 : i32
    %c0_i32_1 = arith.constant 0 : i32
    return %c0_i32, %c0_i32_0 : i32, i32
  }
  func.func @transform_1(%arg0: i32) -> (i32, i32) {
    %c0_i32 = arith.constant 0 : i32
    %c0_i32_0 = arith.constant 0 : i32
    return %arg0, %c0_i32 : i32, i32
  }
  func.func @transform_2(%arg0: i32) -> (i32, i32) {
    %c0_i32 = arith.constant 0 : i32
    %c0_i32_0 = arith.constant 0 : i32
    return %arg0, %c0_i32 : i32, i32
  }
}

</mosaic_0001>

<bundles_post_ra>
// kernel: _build_rope_cache.1
= control target key start
LH: loop header
LB: loop body
LE: loop exit
PB: predicated region body
PF: predicated region fallthrough
CT: control target
= control target key end

     0   :  { %v11_v0 = vlaneseq  ;;  %v5637_v40 = vmov 683565275   ;;  %v5640_v42 = vmov 2475754826   ;;  %v5630_v44 = vmov 2131351028   ;;  %s5609_s0 = inlined_call_operand.vmem [shape: f32[1,32], index: 0, kind: input, shape index: {}]   ;;  %s5610_s1 = inlined_call_operand.vmem [shape: f32[128,32], index: 1, kind: output, shape index: {0}]   ;;  %s5611_s2 = inlined_call_operand.vmem [shape: f32[128,32], index: 2, kind: output, shape index: {1}]  }
   0x1   :  { %v3728_v2 = vld [vmem:[%s5609_s0] ss:$0 sm:$0xff]  ;;  %v5632_v46 = vmov 2102212464   ;;  %v5626_v48 = vmov 920167782  }
   0x2   :  { %v3723_v1 = vshrl.u32 %v11_v0, 7  ;;  %v5624_v55 = vmov 1326507024  }
   0x4   :  { %v45_v3 = vcvt.s32.f32 %v3723_v1  ;;  %v13_v4 = vadd.s32 8, %v3723_v1  ;;  %v14_v5 = vadd.s32 16, %v3723_v1  ;;  %v3752_v22 = vadd.s32 24, %v3723_v1 }
   0x5   :  { %v3755_v27 = vadd.s32 32, %v3723_v1  ;;  %v3758_v30 = vadd.s32 40, %v3723_v1  ;;  %v3761_v31 = vadd.s32 48, %v3723_v1 }
   0x6   :  { %v3734_v6 = vmul.f32 %v3728_v2, %v45_v3  ;;  %v46_v7 = vcvt.s32.f32 %v13_v4  ;;  %v47_v8 = vcvt.s32.f32 %v14_v5  ;;  %v48_v35 = vcvt.s32.f32 %v3752_v22 }
   0x8   :  { %v84_v9 = vand.u32 2147483647, %v3734_v6  ;;  %v87_v10 = vand.u32 2139095040, %v3734_v6  ;;  %v3739_v11 = vmul.f32 %v3728_v2, %v46_v7  ;;  %v3742_v12 = vmul.f32 %v3728_v2, %v47_v8 }
   0xa   :  { %v88_v13 = vshrl.u32 %v87_v10, 23  ;;  %v91_v14 = vand.u32 8388607, %v84_v9  ;;  %v187_v15 = vand.u32 2147483647, %v3739_v11  ;;  %v190_v16 = vand.u32 2139095040, %v3739_v11 }
   0xb   :  { %v293_v20 = vand.u32 2139095040, %v3742_v12  ;;  %v290_v34 = vand.u32 2147483647, %v3742_v12 }
   0xc   :  { %v3438_v17 = vadd.s32 4294967169, %v88_v13  ;;  %v191_v18 = vshrl.u32 %v190_v16, 23  ;;  %v194_v19 = vand.u32 8388607, %v187_v15  ;;  %v92_v23 = vor.u32 8388608, %v91_v14 }
   0xd   :  { %v294_v26 = vshrl.u32 %v293_v20, 23 }
   0xe   :  { %v94_v21 = vadd.s32 1, %v3438_v17  ;;  %v3442_v24 = vadd.s32 4294967169, %v191_v18  ;;  %v195_v25 = vor.u32 8388608, %v194_v19  ;;  %v3765_v36 = vshll.u32 %v92_v23, 8 }
   0xf   :  { %v3769_v38 = vadd.s32 4294967169, %v294_v26 }
  0x10   :  { %vm95_vm0 = vcmp.gt.s32.totalorder %v94_v21, 0  ;;  %v197_v29 = vadd.s32 1, %v3442_v24  ;;  %v3767_v37 = vshll.u32 %v195_v25, 8 }
  0x11   :  { %v96_v28 = vsel %vm95_vm0, %v94_v21, 0 }
  0x12   :  { %v97_v32 = vshrl.u32 %v96_v28, 5  ;;  %v98_v33 = vand.u32 31, %v96_v28  ;;  %vm198_vm1 = vcmp.gt.s32.totalorder %v197_v29, 0 }
  0x13   :  { %v199_v60 = vsel %vm198_vm1, %v197_v29, 0 }
  0x14   :  { %v99_v39 = vsub.s32 32, %v98_v33  ;;  %v101_v41 = vshll.u32 %v5637_v40, %v98_v33  ;;  %v104_v43 = vshll.u32 %v5640_v42, %v98_v33  ;;  %v107_v45 = vshll.u32 %v5630_v44, %v98_v33 }
  0x15   :  { %v110_v47 = vshll.u32 %v5632_v46, %v98_v33  ;;  %v113_v49 = vshll.u32 %v5626_v48, %v98_v33  ;;  %vm116_vm2 = vcmp.lt.s32.totalorder %v97_v32, 1  ;;  %vm117_vm3 = vcmp.lt.s32.totalorder %v97_v32, 2 }
  0x16   :  { %v100_v50 = vshrl.u32 %v5637_v40, %v99_v39  ;;  %v102_v51 = vshrl.u32 %v5640_v42, %v99_v39  ;;  %v105_v52 = vshrl.u32 %v5630_v44, %v99_v39  ;;  %v108_v53 = vshrl.u32 %v5632_v46, %v99_v39 }
  0x17   :  { %v111_v54 = vshrl.u32 %v5626_v48, %v99_v39  ;;  %v114_v56 = vshrl.u32 %v5624_v55, %v99_v39  ;;  %vm118_vm4 = vcmp.lt.s32.totalorder %v97_v32, 3  ;;  %vm119_vm5 = vcmp.lt.s32.totalorder %v97_v32, 4 }
  0x18   :  { %v103_v57 = vor.u32 %v102_v51, %v101_v41  ;;  %v106_v58 = vor.u32 %v105_v52, %v104_v43  ;;  %v109_v59 = vor.u32 %v108_v53, %v107_v45  ;;  %v200_v63 = vshrl.u32 %v199_v60, 5 }
  0x19   :  { %v112_v61 = vor.u32 %v111_v54, %v110_v47  ;;  %v115_v62 = vor.u32 %v114_v56, %v113_v49  ;;  %v201_v0 = vand.u32 31, %v199_v60  ;;  %v300_v54 = vadd.s32 1, %v3769_v38 }
  0x1a   :  { %v120_v3 = vsel %vm116_vm2, %v100_v50, %v103_v57  ;;  %v121_v4 = vsel %vm119_vm5, %v109_v59, 2102212464  ;;  %v124_v5 = vsel %vm116_vm2, %v103_v57, %v106_v58  ;;  %v128_v7 = vsel %vm116_vm2, %v106_v58, %v109_v59 }
  0x1b   :  { %v122_v8 = vsel %vm118_vm4, %v106_v58, %v121_v4  ;;  %v125_v10 = vsel %vm119_vm5, %v112_v61, 920167782  ;;  %v129_v13 = vsel %vm119_vm5, %v115_v62, 1326507024  ;;  %v202_v14 = vsub.s32 32, %v201_v0 }
  0x1c   :  { %v123_v16 = vsel %vm117_vm3, %v120_v3, %v122_v8  ;;  %v126_v17 = vsel %vm118_vm4, %v109_v59, %v125_v10  ;;  %v130_v18 = vsel %vm118_vm4, %v112_v61, %v129_v13  ;;  %v204_v19 = vshll.u32 %v5637_v40, %v201_v0 }
  0x1d   :  { %v127_v20 = vsel %vm117_vm3, %v124_v5, %v126_v17  ;;  %v131_v21 = vsel %vm117_vm3, %v128_v7, %v130_v18  ;;  %v139_v23 = vmul.u32 %v3765_v36, %v123_v16  ;;  %v203_v24 = vshrl.u32 %v5637_v40, %v202_v14 }
  0x1e   :  { %v3796_v25 = vmul.u32.u64.low %v3765_v36, %v131_v21  ;;  %v3797_v26 = vmul.u32.u64.high %v3765_v36, %v131_v21, %v3796_v25  ;;  %v3800_v28 = vmul.u32.u64.low %v3765_v36, %v127_v20  ;;  %v3801_v29 = vmul.u32.u64.high %v3765_v36, %v127_v20, %v3800_v28 }
  0x1f   :  { %v205_v33 = vshrl.u32 %v5640_v42, %v202_v14  ;;  %v207_v39 = vshll.u32 %v5640_v42, %v201_v0  ;;  %v208_v32 = vshrl.u32 %v5630_v44, %v202_v14  ;;  %v210_v41 = vshll.u32 %v5630_v44, %v201_v0 }
  0x20   :  { %v211_v43 = vshrl.u32 %v5632_v46, %v202_v14  ;;  %v213_v45 = vshll.u32 %v5632_v46, %v201_v0  ;;  %v214_v47 = vshrl.u32 %v5626_v48, %v202_v14  ;;  %v216_v49 = vshll.u32 %v5626_v48, %v201_v0 }
  0x21   :  { %v206_v50 = vor.u32 %v205_v33, %v204_v19  ;;  %v209_v36 = vor.u32 %v208_v32, %v207_v39  ;;  %v217_v51 = vshrl.u32 %v5624_v55, %v202_v14  ;;  %vm219_vm6 = vcmp.lt.s32.totalorder %v200_v63, 1 }
  0x22   :  { %vm141_vm7 = vc.u32 %v3797_v26, %v3800_v28  ;;  %v142_v52 = vadd.s32 1, %v3801_v29  ;;  %v212_v53 = vor.u32 %v211_v43, %v210_v41  ;;  %v215_v56 = vor.u32 %v214_v47, %v213_v45 }
  0x23   :  { %v218_v57 = vor.u32 %v217_v51, %v216_v49  ;;  %vm220_vm8 = vcmp.lt.s32.totalorder %v200_v63, 2  ;;  %vm221_vm9 = vcmp.lt.s32.totalorder %v200_v63, 3  ;;  %vm222_vm10 = vcmp.lt.s32.totalorder %v200_v63, 4 }
  0x24   :  { %v143_v58 = vsel %vm141_vm7, %v142_v52, %v3801_v29  ;;  %v223_v59 = vsel %vm219_vm6, %v203_v24, %v206_v50  ;;  %v227_v60 = vsel %vm219_vm6, %v206_v50, %v209_v36  ;;  %v224_v62 = vsel %vm222_vm10, %v212_v53, 2102212464 }
  0x25   :  { %v144_v61 = vadd.s32 %v143_v58, %v139_v23  ;;  %v228_v0 = vsel %vm222_vm10, %v215_v56, 920167782  ;;  %v231_v3 = vsel %vm219_vm6, %v209_v36, %v212_v53  ;;  %v225_v4 = vsel %vm221_vm9, %v209_v36, %v224_v62 }
  0x26   :  { %v229_v5 = vsel %vm221_vm9, %v212_v53, %v228_v0  ;;  %v232_v7 = vsel %vm222_vm10, %v218_v57, 1326507024  ;;  %vm301_vm11 = vcmp.gt.s32.totalorder %v300_v54, 0  ;;  %v297_v13 = vand.u32 8388607, %v290_v34 }
  0x27   :  { %v145_v38 = vadd.s32 536870912, %v144_v61  ;;  %v230_v8 = vsel %vm220_vm8, %v227_v60, %v229_v5  ;;  %v233_v10 = vsel %vm221_vm9, %v215_v56, %v232_v7  ;;  %v226_v14 = vsel %vm220_vm8, %v223_v59, %v225_v4 }
  0x28   :  { %v234_v16 = vsel %vm220_vm8, %v231_v3, %v233_v10  ;;  %v3827_v17 = vmul.u32.u64.low %v3767_v37, %v230_v8  ;;  %v3828_v18 = vmul.u32.u64.high %v3767_v37, %v230_v8, %v3827_v17  ;;  %v302_v23 = vsel %vm301_vm11, %v300_v54, 0 }
  0x29   :  { %v3831_v19 = vshrl.u32 %v145_v38, 30  ;;  %v3834_v20 = vmul.u32.u64.low %v3767_v37, %v234_v16  ;;  %v3835_v21 = vmul.u32.u64.high %v3767_v37, %v234_v16, %v3834_v20  ;;  %v304_v24 = vand.u32 31, %v302_v23 }
  0x2a   :  { %v49_v25 = vcvt.s32.f32 %v3755_v27  ;;  %v50_v29 = vcvt.s32.f32 %v3758_v30  ;;  %v242_v33 = vmul.u32 %v3767_v37, %v226_v14  ;;  %v245_v39 = vadd.s32 1, %v3828_v18 }
  0x2b   :  { %v147_v63 = vshll.u32 %v3831_v19, 30  ;;  %v305_v32 = vsub.s32 32, %v304_v24  ;;  %v51_v41 = vcvt.s32.f32 %v3761_v31  ;;  %vm244_vm12 = vc.u32 %v3835_v21, %v3827_v17 }
  0x2c   :  { %v298_v45 = vor.u32 8388608, %v297_v13  ;;  %v3850_v27 = vmul.f32 %v3728_v2, %v48_v35  ;;  %v246_v30 = vsel %vm244_vm12, %v245_v39, %v3828_v18  ;;  %v307_v37 = vshll.u32 %v5637_v40, %v304_v24 }
  0x2d   :  { %v3843_v43 = vsub.s32 %v144_v61, %v147_v63  ;;  %v3855_v47 = vmul.f32 %v3728_v2, %v49_v25  ;;  %v3858_v49 = vmul.f32 %v3728_v2, %v50_v29  ;;  %v247_v36 = vadd.s32 %v246_v30, %v242_v33 }
  0x2e   :  { %5703 = vst [vmem:[#allocation2_spill] sm:$0xff] %v3850_v27  ;;  %v308_v51 = vshrl.u32 %v5640_v42, %v305_v32  ;;  %v310_v22 = vshll.u32 %v5640_v42, %v304_v24  ;;  %v311_v35 = vshrl.u32 %v5630_v44, %v305_v32  ;;  %v313_v52 = vshll.u32 %v5630_v44, %v304_v24 }
  0x2f   :  { %5704 = vst [vmem:[#allocation3_spill] sm:$0xff] %v3855_v47  ;;  %5705 = vst [vmem:[#allocation4_spill] sm:$0xff] %v3858_v49  ;;  %v150_v50 = vsub.s32 0, %v3843_v43  ;;  %v314_v53 = vshrl.u32 %v5632_v46, %v305_v32  ;;  %v316_v54 = vshll.u32 %v5632_v46, %v304_v24  ;;  %v303_v57 = vshrl.u32 %v302_v23, 5 }
  0x30   :  { %v3868_v58 = vshll.u32 %v298_v45, 8  ;;  %v393_v59 = vand.u32 2147483647, %v3850_v27  ;;  %v248_v60 = vadd.s32 536870912, %v247_v36  ;;  %v306_v61 = vshrl.u32 %v5637_v40, %v305_v32 }
  0x31   :  { %v3439_v56 = vmin.u32 %v150_v50, %v3843_v43  ;;  %v317_v62 = vshrl.u32 %v5626_v48, %v305_v32  ;;  %v396_v0 = vand.u32 2139095040, %v3850_v27  ;;  %v309_v4 = vor.u32 %v308_v51, %v307_v37 }
  0x32   :  { %v319_v5 = vshll.u32 %v5626_v48, %v304_v24  ;;  %v320_v7 = vshrl.u32 %v5624_v55, %v305_v32  ;;  %v3876_v38 = vshrl.u32 %v248_v60, 30  ;;  %v312_v8 = vor.u32 %v311_v35, %v310_v22 }
  0x33   :  { %v152_v3 = vclz %v3439_v56  ;;  %v315_v10 = vor.u32 %v314_v53, %v313_v52  ;;  %v318_v13 = vor.u32 %v317_v62, %v316_v54  ;;  %v140_v14 = vadd.s32 %v3800_v28, %v3797_v26 }
  0x34   :  { %vm322_vm13 = vcmp.lt.s32.totalorder %v303_v57, 1  ;;  %vm325_vm14 = vcmp.lt.s32.totalorder %v303_v57, 4  ;;  %v250_v18 = vshll.u32 %v3876_v38, 30  ;;  %v321_v20 = vor.u32 %v320_v7, %v319_v5 }
  0x35   :  { %v3440_v16 = vadd.s32 4294967294, %v152_v3  ;;  %v327_v23 = vsel %vm325_vm14, %v315_v10, 2102212464  ;;  %v397_v25 = vshrl.u32 %v396_v0, 23  ;;  %vm323_vm0 = vcmp.lt.s32.totalorder %v303_v57, 2 }
  0x36   :  { %vm324_vm1 = vcmp.lt.s32.totalorder %v303_v57, 3  ;;  %v331_v24 = vsel %vm325_vm14, %v318_v13, 920167782  ;;  %vm86_vm2 = vcmp.lt.s32.totalorder %v3734_v6, 0  ;;  %v3884_v63 = vsub.s32 %v247_v36, %v250_v18 }
  0x37   :  { %vm3441_vm15 = vcmp.lt.s32.totalorder %v3440_v16, 0  ;;  %v326_v26 = vsel %vm322_vm13, %v306_v61, %v309_v4  ;;  %v330_v28 = vsel %vm322_vm13, %v309_v4, %v312_v8  ;;  %v328_v45 = vsel %vm324_vm1, %v312_v8, %v327_v23 }
  0x38   :  { %v155_v29 = vsel %vm3441_vm15, 0, %v3440_v16  ;;  %v253_v30 = vsub.s32 0, %v3884_v63  ;;  %v332_v37 = vsel %vm324_vm1, %v315_v10, %v331_v24  ;;  %v334_v50 = vsel %vm322_vm13, %v312_v8, %v315_v10 }
  0x39   :  { %v156_v33 = vsub.s32 32, %v155_v29  ;;  %v157_v39 = vshll.u32 %v3843_v43, %v155_v29  ;;  %v160_v32 = vsub.s32 4294967266, %v155_v29  ;;  %v335_v51 = vsel %vm325_vm14, %v321_v20, 1326507024 }
  0x3a   :  { %vm189_vm3 = vcmp.lt.s32.totalorder %v3739_v11, 0  ;;  %v336_v35 = vsel %vm324_vm1, %v318_v13, %v335_v51  ;;  %vm3898_vm4 = vcmp.le.f32.partialorder %v84_v9, 0.7853982  ;;  %v170_v52 = vsub.s32 4, %v3831_v19 }
  0x3b   :  { %v158_v36 = vshrl.u32 %v140_v14, %v156_v33  ;;  %v161_v22 = vadd.s32 127, %v160_v32  ;;  %v3443_v53 = vmin.u32 %v253_v30, %v3884_v63  ;;  %v333_v54 = vsel %vm323_vm0, %v330_v28, %v332_v37 }
  0x3c   :  { %v3907_v56 = vand.u32 8388607, %v393_v59  ;;  %v329_v62 = vsel %vm323_vm0, %v326_v26, %v328_v45  ;;  %v337_v0 = vsel %vm323_vm0, %v334_v50, %v336_v35  ;;  %v3450_v5 = vadd.s32 4294967169, %v397_v25 }
  0x3d   :  { %v159_v60 = vor.u32 %v158_v36, %v157_v39  ;;  %v162_v61 = vshll.u32 %v161_v22, 23  ;;  %v255_v9 = vclz %v3443_v53  ;;  %vm3922_vm5 = vcmp.le.f32.partialorder %v187_v15, 0.7853982 }
  0x3e   :  { %v3912_v3 = vmul.u32.u64.low %v3868_v58, %v337_v0  ;;  %v3913_v4 = vmul.u32.u64.high %v3868_v58, %v337_v0, %v3912_v3  ;;  %v3916_v10 = vmul.u32.u64.low %v3868_v58, %v333_v54  ;;  %v3917_v13 = vmul.u32.u64.high %v3868_v58, %v333_v54, %v3916_v10 }
  0x3f   :  { %v163_v7 = vor.u32 4788187, %v162_v61  ;;  %v166_v8 = vcvt.s32.f32 %v159_v60  ;;  %v3444_v57 = vadd.s32 4294967294, %v255_v9  ;;  %v273_v16 = vsub.s32 4, %v3876_v38 }
  0x40   :  { %v403_v18 = vadd.s32 1, %v3450_v5  ;;  %v171_v23 = vsel %vm86_vm2, %v170_v52, %v3831_v19  ;;  %v243_v25 = vadd.s32 %v3827_v17, %v3835_v21  ;;  %v401_v24 = vor.u32 8388608, %v3907_v56 }
  0x41   :  { %v164_v20 = vand.u32 2147483647, %v163_v7  ;;  %vm3445_vm6 = vcmp.lt.s32.totalorder %v3444_v57, 0  ;;  %v345_v15 = vmul.u32 %v3868_v58, %v329_v62  ;;  %vm347_vm7 = vc.u32 %v3913_v4, %v3916_v10 }
  0x42   :  { %vm404_vm8 = vcmp.gt.s32.totalorder %v403_v18, 0  ;;  %v258_v26 = vsel %vm3445_vm6, 0, %v3444_v57  ;;  %v348_v28 = vadd.s32 1, %v3917_v13  ;;  %v274_v17 = vsel %vm189_vm3, %v273_v16, %v3876_v38 }
  0x43   :  { %v167_v29 = vmul.f32 %v166_v8, %v164_v20  ;;  %v405_v33 = vsel %vm404_vm8, %v403_v18, 0  ;;  %v259_v39 = vsub.s32 32, %v258_v26  ;;  %v260_v19 = vshll.u32 %v3884_v63, %v258_v26 }
  0x44   :  { %v263_v32 = vsub.s32 4294967266, %v258_v26  ;;  %v3943_v58 = vsel %vm3898_vm4, 0, %v171_v23  ;;  %v349_v45 = vsel %vm347_vm7, %v348_v28, %v3917_v13  ;;  %v407_v30 = vand.u32 31, %v405_v33 }
  0x45   :  { %v168_v21 = vxor.u32 2147483648, %v167_v29  ;;  %v3947_v37 = vand.u32 3, %v3943_v58  ;;  %v261_v50 = vshrl.u32 %v243_v25, %v259_v39  ;;  %v350_v36 = vadd.s32 %v349_v45, %v345_v15 }
  0x46   :  { %v264_v51 = vadd.s32 127, %v263_v32  ;;  %v3953_v38 = vsel %vm3922_vm5, 0, %v274_v17  ;;  %v408_v22 = vsub.s32 32, %v407_v30  ;;  %v410_v35 = vshll.u32 %v5637_v40, %v407_v30 }
  0x47   :  { %v169_v63 = vsel %vm86_vm2, %v168_v21, %v167_v29  ;;  %v262_v53 = vor.u32 %v261_v50, %v260_v19  ;;  %v351_v56 = vadd.s32 536870912, %v350_v36  ;;  %v413_v61 = vshll.u32 %v5640_v42, %v407_v30 }
  0x48   :  { %v172_v52 = vsel %vm3898_vm4, %v3734_v6, %v169_v63  ;;  %v265_v54 = vshll.u32 %v264_v51, 23  ;;  %v411_v60 = vshrl.u32 %v5640_v42, %v408_v22  ;;  %v414_v62 = vshrl.u32 %v5630_v44, %v408_v22 }
  0x49   :  { %3636 = vcosq.f32 %v172_v52  ;;  %v269_v9 = vcvt.s32.f32 %v262_v53  ;;  %v3962_v3 = vshrl.u32 %v351_v56, 30  ;;  %vm182_vm9 = vcmp.eq.s32.totalorder %v3947_v37, 2 }
  0x4a   :  { %3638 = vsinq.f32 %v172_v52  ;;  %v266_v0 = vor.u32 4788187, %v265_v54  ;;  %v3966_v43 = vand.u32 3, %v3953_v38  ;;  %v406_v5 = vshrl.u32 %v405_v33, 5 }
  0x4b   :  { %v416_v7 = vshll.u32 %v5630_v44, %v407_v30  ;;  %v417_v8 = vshrl.u32 %v5632_v46, %v408_v22  ;;  %vm179_vm10 = vcmp.eq.s32.totalorder %v3947_v37, 0  ;;  %v353_v57 = vshll.u32 %v3962_v3, 30 }
  0x4c   :  { %v267_v13 = vand.u32 2147483647, %v266_v0  ;;  %v419_v16 = vshll.u32 %v5632_v46, %v407_v30  ;;  %v3973_v18 = vshll.u32 %v401_v24, 8  ;;  %vm178_vm11 = vcmp.lt.s32.totalorder %v3947_v37, 2 }
  0x4d   :  { %v412_v20 = vor.u32 %v411_v60, %v410_v35  ;;  %v415_v23 = vor.u32 %v414_v62, %v413_v61  ;;  %v420_v25 = vshrl.u32 %v5626_v48, %v408_v22  ;;  %v499_v15 = vand.u32 2139095040, %v3855_v47 }
  0x4e   :  { %vm176_vm12 = vweird.f32 %v3734_v6  ;;  %v270_v29 = vmul.f32 %v269_v9, %v267_v13  ;;  %v3979_v26 = vsub.s32 %v350_v36, %v353_v57  ;;  %v422_v28 = vshll.u32 %v5626_v48, %v407_v30 }
  0x4f   :  { %v423_v33 = vshrl.u32 %v5624_v55, %v408_v22  ;;  %vm1732_vm13 = vcmask 261120   ;;  %v409_v24 = vshrl.u32 %v5637_v40, %v408_v22  ;;  %v418_v39 = vor.u32 %v417_v8, %v416_v7 }
  0x50   :  { %v421_v19 = vor.u32 %v420_v25, %v419_v16  ;;  %vm425_vm14 = vcmp.lt.s32.totalorder %v406_v5, 1  ;;  %v271_v32 = vxor.u32 2147483648, %v270_v29  ;;  %v356_v17 = vsub.s32 0, %v3979_v26 }
  0x51   :  { %vm427_vm15 = vcmp.lt.s32.totalorder %v406_v5, 3  ;;  %vm428_vm0 = vcmp.lt.s32.totalorder %v406_v5, 4  ;;  %v346_v21 = vadd.s32 %v3916_v10, %v3913_v4  ;;  %vm426_vm1 = vcmp.lt.s32.totalorder %v406_v5, 2 }
  0x52   :  { %v430_v45 = vsel %vm428_vm0, %v418_v39, 2102212464  ;;  %v434_v30 = vsel %vm428_vm0, %v421_v19, 920167782  ;;  %v272_v50 = vsel %vm189_vm3, %v271_v32, %v270_v29  ;;  %v3447_v51 = vmin.u32 %v356_v17, %v3979_v26 }
  0x53   :  { %v424_v36 = vor.u32 %v423_v33, %v422_v28  ;;  %v433_v63 = vsel %vm425_vm14, %v412_v20, %v415_v23  ;;  %v3993_v22 = vpop.eup %3636  ;;  %v275_v35 = vsel %vm3922_vm5, %v3739_v11, %v272_v50  ;;  %v429_v4 = vsel %vm425_vm14, %v409_v24, %v412_v20 }
  0x54   :  { %v431_v10 = vsel %vm427_vm15, %v415_v23, %v430_v45  ;;  %v435_v52 = vsel %vm427_vm15, %v418_v39, %v434_v30  ;;  %v4001_v53 = vpop.eup %3638  ;;  %v5620_v54 = vxor.u32 2147483648, %v3993_v22  ;;  %3640 = vcosq.f32 %v275_v35 }
  0x55   :  { %v358_v56 = vclz %v3447_v51  ;;  %v500_v60 = vshrl.u32 %v499_v15, 23  ;;  %v5621_v61 = vxor.u32 2147483648, %v4001_v53  ;;  %3642 = vsinq.f32 %v275_v35 }
  0x56   :  { %v436_v62 = vsel %vm426_vm1, %v433_v63, %v435_v52  ;;  %v437_v14 = vsel %vm425_vm14, %v415_v23, %v418_v39  ;;  %v184_v0 = vsel %vm182_vm9, %v5620_v54, %v4001_v53  ;;  %v432_v7 = vsel %vm426_vm1, %v429_v4, %v431_v10 }
  0x57   :  { %v3448_v9 = vadd.s32 4294967294, %v358_v56  ;;  %v438_v8 = vsel %vm428_vm0, %v424_v36, 1326507024  ;;  %v181_v13 = vsel %vm179_vm10, %v3993_v22, %v5621_v61  ;;  %v3454_v15 = vadd.s32 4294967169, %v500_v60 }
  0x58   :  { %v439_v57 = vsel %vm427_vm15, %v421_v19, %v438_v8  ;;  %v4021_v16 = vmul.u32.u64.low %v3973_v18, %v436_v62  ;;  %v4022_v20 = vmul.u32.u64.high %v3973_v18, %v436_v62, %v4021_v16  ;;  %v185_v23 = vsel %vm178_vm11, %v181_v13, %v184_v0 }
  0x59   :  { %vm3449_vm2 = vcmp.lt.s32.totalorder %v3448_v9, 0  ;;  %v440_v25 = vsel %vm426_vm1, %v437_v14, %v439_v57  ;;  %v186_v29 = vsel %vm176_vm12, nan, %v185_v23  ;;  %vm279_vm3 = vweird.f32 %v3739_v11 }
  0x5a   :  { %v361_v28 = vsel %vm3449_vm2, 0, %v3448_v9  ;;  %v4031_v33 = vmul.u32.u64.low %v3973_v18, %v440_v25  ;;  %v4032_v24 = vmul.u32.u64.high %v3973_v18, %v440_v25, %v4031_v33  ;;  %1733 = vst.msk [vmem:[%s5610_s1] sm:$0xff] %vm1732_vm13, %v186_v29  ;;  %vm292_vm4 = vcmp.lt.s32.totalorder %v3742_v12, 0 }
  0x5b   :  { %v362_v37 = vsub.s32 32, %v361_v28  ;;  %v363_v5 = vshll.u32 %v3979_v26, %v361_v28  ;;  %v366_v39 = vsub.s32 4294967266, %v361_v28  ;;  %v448_v19 = vmul.u32 %v3973_v18, %v432_v7 }
  0x5c   :  { %v451_v32 = vadd.s32 1, %v4022_v20  ;;  %v506_v17 = vadd.s32 1, %v3454_v15  ;;  %vm281_vm5 = vcmp.lt.s32.totalorder %v3966_v43, 2  ;;  %v496_v50 = vand.u32 2147483647, %v3855_v47 }
  0x5d   :  { %v364_v45 = vshrl.u32 %v346_v21, %v362_v37  ;;  %v367_v30 = vadd.s32 127, %v366_v39  ;;  %vm285_vm6 = vcmp.eq.s32.totalorder %v3966_v43, 2  ;;  %v376_v51 = vsub.s32 4, %v3962_v3 }
  0x5e   :  { %vm450_vm7 = vc.u32 %v4032_v24, %v4021_v16  ;;  %vm507_vm8 = vcmp.gt.s32.totalorder %v506_v17, 0  ;;  %v4049_v26 = vpop.eup %3640  ;;  %vm282_vm9 = vcmp.eq.s32.totalorder %v3966_v43, 0  ;;  %v503_v14 = vand.u32 8388607, %v496_v50 }
  0x5f   :  { %v365_v18 = vor.u32 %v364_v45, %v363_v5  ;;  %v368_v36 = vshll.u32 %v367_v30, 23  ;;  %v452_v63 = vsel %vm450_vm7, %v451_v32, %v4022_v20  ;;  %v508_v35 = vsel %vm507_vm8, %v506_v17, 0  ;;  %v4052_v4 = vpop.eup %3642 }
  0x60   :  { %v5616_v21 = vxor.u32 2147483648, %v4049_v26  ;;  %v453_v10 = vadd.s32 %v452_v63, %v448_v19  ;;  %v510_v52 = vand.u32 31, %v508_v35  ;;  %v5617_v56 = vxor.u32 2147483648, %v4052_v4 }
  0x61   :  { %v369_v60 = vor.u32 4788187, %v368_v36  ;;  %v372_v62 = vcvt.s32.f32 %v365_v18  ;;  %v377_v9 = vsel %vm292_vm4, %v376_v51, %v3962_v3  ;;  %vm4088_vm10 = vcmp.le.f32.partialorder %v290_v34, 0.7853982 }
  0x62   :  { %v287_v0 = vsel %vm285_vm6, %v5616_v21, %v4052_v4  ;;  %v454_v7 = vadd.s32 536870912, %v453_v10  ;;  %v511_v8 = vsub.s32 32, %v510_v52  ;;  %v284_v13 = vsel %vm282_vm9, %v4049_v26, %v5617_v56 }
  0x63   :  { %v370_v57 = vand.u32 2147483647, %v369_v60  ;;  %v513_v20 = vshll.u32 %v5637_v40, %v510_v52  ;;  %v516_v23 = vshll.u32 %v5640_v42, %v510_v52  ;;  %v288_v25 = vsel %vm281_vm5, %v284_v13, %v287_v0 }
  0x64   :  { %v4074_v15 = vshrl.u32 %v454_v7, 30  ;;  %v514_v29 = vshrl.u32 %v5640_v42, %v511_v8  ;;  %v519_v3 = vshll.u32 %v5630_v44, %v510_v52  ;;  %v289_v28 = vsel %vm279_vm3, nan, %v288_v25 }
  0x65   :  { %v373_v33 = vmul.f32 %v372_v62, %v370_v57  ;;  %v517_v37 = vshrl.u32 %v5630_v44, %v511_v8  ;;  %v520_v5 = vshrl.u32 %v5632_v46, %v511_v8  ;;  %1734 = vst.msk [vmem:[%s5610_s1 + $0x8] sm:$0xff] %vm1732_vm13, %v289_v28  ;;  %v509_v19 = vshrl.u32 %v508_v35, 5 }
  0x66   :  { %v456_v39 = vshll.u32 %v4074_v15, 30  ;;  %v522_v32 = vshll.u32 %v5632_v46, %v510_v52  ;;  %v4096_v45 = vsel %vm4088_vm10, 0, %v377_v9  ;;  %v504_v30 = vor.u32 8388608, %v503_v14 }
  0x67   :  { %v374_v17 = vxor.u32 2147483648, %v373_v33  ;;  %v523_v51 = vshrl.u32 %v5626_v48, %v511_v8  ;;  %v512_v34 = vshrl.u32 %v5637_v40, %v511_v8  ;;  %v525_v36 = vshll.u32 %v5626_v48, %v510_v52 }
  0x68   :  { %v4099_v18 = vsub.s32 %v453_v10, %v456_v39  ;;  %v526_v63 = vshrl.u32 %v5624_v55, %v511_v8  ;;  %v515_v60 = vor.u32 %v514_v29, %v513_v20  ;;  %v518_v62 = vor.u32 %v517_v37, %v516_v23 }
  0x69   :  { %v375_v35 = vsel %vm292_vm4, %v374_v17, %v373_v33  ;;  %v521_v0 = vor.u32 %v520_v5, %v519_v3  ;;  %v524_v10 = vor.u32 %v523_v51, %v522_v32  ;;  %vm528_vm11 = vcmp.lt.s32.totalorder %v509_v19, 1 }
  0x6a   :  { %v378_v14 = vsel %vm4088_vm10, %v3742_v12, %v375_v35  ;;  %v459_v9 = vsub.s32 0, %v4099_v18  ;;  %v527_v7 = vor.u32 %v526_v63, %v525_v36  ;;  %vm531_vm14 = vcmp.lt.s32.totalorder %v509_v19, 4 }
  0x6b   :  { %3644 = vcosq.f32 %v378_v14  ;;  %v602_v52 = vand.u32 2139095040, %v3858_v49  ;;  %v383_v8 = vand.u32 3, %v4096_v45  ;;  %vm530_vm15 = vcmp.lt.s32.totalorder %v509_v19, 3 }
  0x6c   :  { %3646 = vsinq.f32 %v378_v14  ;;  %v3451_v13 = vmin.u32 %v459_v9, %v4099_v18  ;;  %vm529_vm0 = vcmp.lt.s32.totalorder %v509_v19, 2  ;;  %v533_v57 = vsel %vm531_vm14, %v521_v0, 2102212464 }
  0x6d   :  { %v536_v20 = vsel %vm528_vm11, %v515_v60, %v518_v62  ;;  %v544_v23 = vshll.u32 %v504_v30, 8  ;;  %v532_v29 = vsel %vm528_vm11, %v512_v34, %v515_v60  ;;  %v537_v3 = vsel %vm531_vm14, %v524_v10, 920167782 }
  0x6e   :  { %v461_v25 = vclz %v3451_v13  ;;  %v540_v28 = vsel %vm528_vm11, %v518_v62, %v521_v0  ;;  %v534_v33 = vsel %vm530_vm15, %v518_v62, %v533_v57  ;;  %v538_v37 = vsel %vm530_vm15, %v521_v0, %v537_v3 }
  0x6f   :  { %v541_v5 = vsel %vm531_vm14, %v527_v7, 1326507024  ;;  %v603_v43 = vshrl.u32 %v602_v52, 23  ;;  %v449_v39 = vadd.s32 %v4021_v16, %v4032_v24  ;;  %v539_v17 = vsel %vm529_vm0, %v536_v20, %v538_v37 }
  0x70   :  { %v3452_v32 = vadd.s32 4294967294, %v461_v25  ;;  %v542_v30 = vsel %vm530_vm15, %v524_v10, %v541_v5  ;;  %v4126_v34 = vmul.u32.u64.low %v544_v23, %v539_v17  ;;  %v4127_v36 = vmul.u32.u64.high %v544_v23, %v539_v17, %v4126_v34 }
  0x71   :  { %v543_v51 = vsel %vm529_vm0, %v540_v28, %v542_v30  ;;  %v3458_v63 = vadd.s32 4294967169, %v603_v43  ;;  %v535_v35 = vsel %vm529_vm0, %v532_v29, %v534_v33  ;;  %vm382_vm2 = vweird.f32 %v3742_v12 }
  0x72   :  { %vm3453_vm1 = vcmp.lt.s32.totalorder %v3452_v32, 0  ;;  %v4131_v60 = vmul.u32.u64.low %v544_v23, %v543_v51  ;;  %v4132_v62 = vmul.u32.u64.high %v544_v23, %v543_v51, %v4131_v60  ;;  %v599_v24 = vand.u32 2147483647, %v3858_v49 }
  0x73   :  { %v464_v16 = vsel %vm3453_vm1, 0, %v3452_v32  ;;  %v609_v0 = vadd.s32 1, %v3458_v63  ;;  %vm384_vm4 = vcmp.lt.s32.totalorder %v383_v8, 2  ;;  %vm388_vm5 = vcmp.eq.s32.totalorder %v383_v8, 2 }
  0x74   :  { %v465_v14 = vsub.s32 32, %v464_v16  ;;  %v466_v9 = vshll.u32 %v4099_v18, %v464_v16  ;;  %v469_v10 = vsub.s32 4294967266, %v464_v16  ;;  %v551_v52 = vmul.u32 %v544_v23, %v535_v35 }
  0x75   :  { %v4137_v7 = vpop.eup %3644  ;;  %v554_v19 = vadd.s32 1, %v4127_v36  ;;  %vm610_vm6 = vcmp.gt.s32.totalorder %v609_v0, 0  ;;  %vm385_vm7 = vcmp.eq.s32.totalorder %v383_v8, 0  ;;  %vm553_vm8 = vc.u32 %v4132_v62, %v4126_v34 }
  0x76   :  { %v4140_v13 = vpop.eup %3646  ;;  %v5614_v57 = vxor.u32 2147483648, %v4137_v7  ;;  %v467_v20 = vshrl.u32 %v449_v39, %v465_v14  ;;  %v470_v25 = vadd.s32 127, %v469_v10  ;;  %v606_v18 = vand.u32 8388607, %v599_v24 }
  0x77   :  { %v5615_v29 = vxor.u32 2147483648, %v4140_v13  ;;  %v611_v3 = vsel %vm610_vm6, %v609_v0, 0  ;;  %v555_v37 = vsel %vm553_vm8, %v554_v19, %v4127_v36  ;;  %vm395_vm9 = vcmp.lt.s32.totalorder %v3850_v27, 0 }
  0x78   :  { %v390_v23 = vsel %vm388_vm5, %v5614_v57, %v4140_v13  ;;  %v468_v28 = vor.u32 %v467_v20, %v466_v9  ;;  %v471_v33 = vshll.u32 %v470_v25, 23  ;;  %v556_v43 = vadd.s32 %v555_v37, %v551_v52 }
  0x79   :  { %v387_v5 = vsel %vm385_vm7, %v4137_v7, %v5615_v29  ;;  %v613_v39 = vand.u32 31, %v611_v3  ;;  %v479_v51 = vsub.s32 4, %v4074_v15  ;;  %v607_v60 = vor.u32 8388608, %v606_v18 }
  0x7a   :  { %v391_v32 = vsel %vm384_vm4, %v387_v5, %v390_v23  ;;  %v472_v17 = vor.u32 4788187, %v471_v33  ;;  %v475_v30 = vcvt.s32.f32 %v468_v28  ;;  %v557_v35 = vadd.s32 536870912, %v556_v43 }
  0x7b   :  { %v392_v63 = vsel %vm382_vm2, nan, %v391_v32  ;;  %v614_v36 = vsub.s32 32, %v613_v39  ;;  %v612_v0 = vshrl.u32 %v611_v3, 5  ;;  %v616_v8 = vshll.u32 %v5637_v40, %v613_v39 }
  0x7c   :  { %1735 = vst.msk [vmem:[%s5610_s1 + $0x10] sm:$0xff] %vm1732_vm13, %v392_v63  ;;  %v473_v16 = vand.u32 2147483647, %v472_v17  ;;  %v619_v14 = vshll.u32 %v5640_v42, %v613_v39  ;;  %v4166_v9 = vshrl.u32 %v557_v35, 30  ;;  %v622_v19 = vshll.u32 %v5630_v44, %v613_v39 }
  0x7d   :  { %v617_v10 = vshrl.u32 %v5640_v42, %v614_v36  ;;  %v620_v52 = vshrl.u32 %v5630_v44, %v614_v36  ;;  %v623_v25 = vshrl.u32 %v5632_v46, %v614_v36  ;;  %v625_v18 = vshll.u32 %v5632_v46, %v613_v39 }
  0x7e   :  { %v476_v20 = vmul.f32 %v475_v30, %v473_v16  ;;  %v626_v23 = vshrl.u32 %v5626_v48, %v614_v36  ;;  %vm4176_vm10 = vcmp.le.f32.partialorder %v393_v59, 0.7853982  ;;  %v480_v28 = vsel %vm395_vm9, %v479_v51, %v4074_v15 }
  0x7f   :  { %v559_v33 = vshll.u32 %v4166_v9, 30  ;;  %v628_v37 = vshll.u32 %v5626_v48, %v613_v39  ;;  %v629_v32 = vshrl.u32 %v5624_v55, %v614_v36  ;;  %v4186_v17 = vshll.u32 %v607_v60, 8 }
  0x80   :  { %v477_v5 = vxor.u32 2147483648, %v476_v20  ;;  %v4191_v59 = vmul.f32 %v3728_v2, %v51_v41  ;;  %v615_v63 = vshrl.u32 %v5637_v40, %v614_v36  ;;  %v618_v35 = vor.u32 %v617_v10, %v616_v8 }
  0x81   :  { %v4193_v30 = vsub.s32 %v556_v43, %v559_v33  ;;  %v621_v15 = vor.u32 %v620_v52, %v619_v14  ;;  %v624_v39 = vor.u32 %v623_v25, %v622_v19  ;;  %v627_v16 = vor.u32 %v626_v23, %v625_v18 }
  0x82   :  { %5714 = vst [vmem:[#allocation5_spill] sm:$0xff] %v4191_v59  ;;  %v478_v51 = vsel %vm395_vm9, %v477_v5, %v476_v20  ;;  %vm631_vm11 = vcmp.lt.s32.totalorder %v612_v0, 1  ;;  %v630_v2 = vor.u32 %v629_v32, %v628_v37  ;;  %vm634_vm14 = vcmp.lt.s32.totalorder %v612_v0, 4 }
  0x83   :  { %v481_v60 = vsel %vm4176_vm10, %v3850_v27, %v478_v51  ;;  %v562_v31 = vsub.s32 0, %v4193_v30  ;;  %vm632_vm15 = vcmp.lt.s32.totalorder %v612_v0, 2  ;;  %vm633_vm0 = vcmp.lt.s32.totalorder %v612_v0, 3 }
  0x84   :  { %3648 = vcosq.f32 %v481_v60  ;;  %v636_v41 = vsel %vm634_vm14, %v624_v39, 2102212464  ;;  %vm498_vm1 = vcmp.lt.s32.totalorder %v3855_v47, 0  ;;  %v635_v36 = vsel %vm631_vm11, %v615_v63, %v618_v35 }
  0x85   :  { %3650 = vsinq.f32 %v481_v60  ;;  %v3455_v43 = vmin.u32 %v562_v31, %v4193_v30  ;;  %v639_v8 = vsel %vm631_vm11, %v618_v35, %v621_v15  ;;  %v4209_v14 = vsel %vm4176_vm10, 0, %v480_v28 }
  0x86   :  { %v637_v10 = vsel %vm633_vm0, %v621_v15, %v636_v41  ;;  %v640_v52 = vsel %vm634_vm14, %v627_v16, 920167782  ;;  %v643_v19 = vsel %vm631_vm11, %v621_v15, %v624_v39  ;;  %v486_v20 = vand.u32 3, %v4209_v14 }
  0x87   :  { %v564_v25 = vclz %v3455_v43  ;;  %v641_v18 = vsel %vm633_vm0, %v624_v39, %v640_v52  ;;  %v644_v23 = vsel %vm634_vm14, %v630_v2, 1326507024  ;;  %v638_v33 = vsel %vm632_vm15, %v635_v36, %v637_v10 }
  0x88   :  { %v642_v37 = vsel %vm632_vm15, %v639_v8, %v641_v18  ;;  %v645_v3 = vsel %vm633_vm0, %v627_v16, %v644_v23  ;;  %v705_v28 = vand.u32 2139095040, %v4191_v59  ;;  %vm485_vm4 = vweird.f32 %v3850_v27 }
  0x89   :  { %v3456_v5 = vadd.s32 4294967294, %v564_v25  ;;  %v646_v32 = vsel %vm632_vm15, %v643_v19, %v645_v3  ;;  %v4224_v63 = vmul.u32.u64.low %v4186_v17, %v642_v37  ;;  %v4225_v35 = vmul.u32.u64.high %v4186_v17, %v642_v37, %v4224_v63 }
  0x8a   :  { %v582_v15 = vsub.s32 4, %v4166_v9  ;;  %v4230_v51 = vmul.u32.u64.low %v4186_v17, %v646_v32  ;;  %v4231_v39 = vmul.u32.u64.high %v4186_v17, %v646_v32, %v4230_v51  ;;  %v706_v60 = vshrl.u32 %v705_v28, 23 }
  0x8b   :  { %vm487_vm5 = vcmp.lt.s32.totalorder %v486_v20, 2  ;;  %vm488_vm6 = vcmp.eq.s32.totalorder %v486_v20, 0  ;;  %v552_v16 = vadd.s32 %v4126_v34, %v4132_v62  ;;  %vm3457_vm7 = vcmp.lt.s32.totalorder %v3456_v5, 0 }
  0x8c   :  { %v567_v0 = vsel %vm3457_vm7, 0, %v3456_v5  ;;  %v654_v31 = vmul.u32 %v4186_v17, %v638_v33  ;;  %v702_v2 = vand.u32 2147483647, %v4191_v59  ;;  %v3462_v41 = vadd.s32 4294967169, %v706_v60 }
  0x8d   :  { %v568_v43 = vsub.s32 32, %v567_v0  ;;  %v569_v36 = vshll.u32 %v4193_v30, %v567_v0  ;;  %v572_v8 = vsub.s32 4294967266, %v567_v0  ;;  %v657_v10 = vadd.s32 1, %v4225_v35 }
  0x8e   :  { %v4239_v52 = vpop.eup %3648  ;;  %vm491_vm8 = vcmp.eq.s32.totalorder %v486_v20, 2  ;;  %v583_v34 = vsel %vm498_vm1, %v582_v15, %v4166_v9  ;;  %vm656_vm9 = vc.u32 %v4231_v39, %v4224_v63  ;;  %v712_v62 = vadd.s32 1, %v3462_v41 }
  0x8f   :  { %v4246_v17 = vpop.eup %3650  ;;  %v5612_v19 = vxor.u32 2147483648, %v4239_v52  ;;  %v570_v25 = vshrl.u32 %v552_v16, %v568_v43  ;;  %v573_v30 = vadd.s32 127, %v572_v8  ;;  %v658_v18 = vsel %vm656_vm9, %v657_v10, %v4225_v35 }
  0x90   :  { %v5613_v23 = vxor.u32 2147483648, %v4246_v17  ;;  %v659_v33 = vadd.s32 %v658_v18, %v654_v31  ;;  %v709_v37 = vand.u32 8388607, %v702_v2  ;;  %vm713_vm10 = vcmp.gt.s32.totalorder %v712_v62, 0 }
  0x91   :  { %v493_v9 = vsel %vm491_vm8, %v5612_v19, %v4246_v17  ;;  %v571_v3 = vor.u32 %v570_v25, %v569_v36  ;;  %v574_v28 = vshll.u32 %v573_v30, 23  ;;  %v714_v5 = vsel %vm713_vm10, %v712_v62, 0 }
  0x92   :  { %v490_v32 = vsel %vm488_vm6, %v4239_v52, %v5613_v23  ;;  %v660_v35 = vadd.s32 536870912, %v659_v33  ;;  %v716_v15 = vand.u32 31, %v714_v5  ;;  %v19_v51 = vadd.s32 56, %v3723_v1 }
  0x93   :  { %v494_v60 = vsel %vm487_vm5, %v490_v32, %v493_v9  ;;  %vm4264_vm11 = vcmp.le.f32.partialorder %v496_v50, 0.7853982  ;;  %v575_v0 = vor.u32 4788187, %v574_v28  ;;  %v578_v31 = vcvt.s32.f32 %v571_v3 }
  0x94   :  { %v495_v41 = vsel %vm485_vm4, nan, %v494_v60  ;;  %v4272_v43 = vsel %vm4264_vm11, 0, %v583_v34  ;;  %v4274_v36 = vshrl.u32 %v660_v35, 30  ;;  %v717_v8 = vsub.s32 32, %v716_v15 }
  0x95   :  { %1736 = vst.msk [vmem:[%s5610_s1 + $0x18] sm:$0xff] %vm1732_vm13, %v495_v41  ;;  %v576_v50 = vand.u32 2147483647, %v575_v0  ;;  %v710_v20 = vor.u32 8388608, %v709_v37  ;;  %v719_v10 = vshll.u32 %v5637_v40, %v716_v15  ;;  %v722_v62 = vshll.u32 %v5640_v42, %v716_v15 }
  0x96   :  { %v662_v25 = vshll.u32 %v4274_v36, 30  ;;  %v720_v30 = vshrl.u32 %v5640_v42, %v717_v8  ;;  %v725_v34 = vshll.u32 %v5630_v44, %v716_v15  ;;  %v728_v18 = vshll.u32 %v5632_v46, %v716_v15 }
  0x97   :  { %v579_v9 = vmul.f32 %v578_v31, %v576_v50  ;;  %v723_v3 = vshrl.u32 %v5630_v44, %v717_v8  ;;  %v726_v28 = vshrl.u32 %v5632_v46, %v717_v8  ;;  %v729_v32 = vshrl.u32 %v5626_v48, %v717_v8 }
  0x98   :  { %v4290_v37 = vand.u32 3, %v4272_v43  ;;  %v4292_v35 = vsub.s32 %v659_v33, %v662_v25  ;;  %v715_v60 = vshrl.u32 %v714_v5, 5  ;;  %v731_v41 = vshll.u32 %v5626_v48, %v716_v15 }
  0x99   :  { %v580_v0 = vxor.u32 2147483648, %v579_v9  ;;  %v4295_v19 = vshll.u32 %v710_v20, 8  ;;  %v52_v23 = vcvt.s32.f32 %v19_v51  ;;  %v718_v50 = vshrl.u32 %v5637_v40, %v717_v8 }
  0x9a   :  { %v665_v31 = vsub.s32 0, %v4292_v35  ;;  %v721_v57 = vor.u32 %v720_v30, %v719_v10  ;;  %v732_v29 = vshrl.u32 %v5624_v55, %v717_v8  ;;  %v724_v56 = vor.u32 %v723_v3, %v722_v62  ;;  %v4311_v3 = vld [vmem:[%s5609_s0] ss:$0 sm:$0xff] }
  0x9b   :  { %v581_v21 = vsel %vm498_vm1, %v580_v0, %v579_v9  ;;  %v727_v33 = vor.u32 %v726_v28, %v725_v34  ;;  %v730_v25 = vor.u32 %v729_v32, %v728_v18  ;;  %vm734_vm14 = vcmp.lt.s32.totalorder %v715_v60, 1 }
  0x9c   :  { %v584_v5 = vsel %vm4264_vm11, %v3855_v47, %v581_v21  ;;  %v3459_v15 = vmin.u32 %v665_v31, %v4292_v35  ;;  %vm735_vm15 = vcmp.lt.s32.totalorder %v715_v60, 2  ;;  %v733_v51 = vor.u32 %v732_v29, %v731_v41 }
  0x9d   :  { %3652 = vcosq.f32 %v584_v5  ;;  %vm736_vm0 = vcmp.lt.s32.totalorder %v715_v60, 3  ;;  %vm737_vm5 = vcmp.lt.s32.totalorder %v715_v60, 4  ;;  %v738_v20 = vsel %vm734_vm14, %v718_v50, %v721_v57 }
  0x9e   :  { %3654 = vsinq.f32 %v584_v5  ;;  %v667_v8 = vclz %v3459_v15  ;;  %v739_v10 = vsel %vm737_vm5, %v727_v33, 2102212464  ;;  %v742_v30 = vsel %vm734_vm14, %v721_v57, %v724_v56 }
  0x9f   :  { %v740_v62 = vsel %vm736_vm0, %v724_v56, %v739_v10  ;;  %v743_v34 = vsel %vm737_vm5, %v730_v25, 920167782  ;;  %v746_v18 = vsel %vm734_vm14, %v724_v56, %v727_v33  ;;  %v747_v16 = vsel %vm737_vm5, %v733_v51, 1326507024 }
  0xa0   :  { %v3460_v9 = vadd.s32 4294967294, %v667_v8  ;;  %v744_v21 = vsel %vm736_vm0, %v727_v33, %v743_v34  ;;  %v4314_v29 = vmul.f32 %v4311_v3, %v52_v23  ;;  %v655_v28 = vadd.s32 %v4224_v63, %v4231_v39 }
  0xa1   :  { %v741_v32 = vsel %vm735_vm15, %v738_v20, %v740_v62  ;;  %v745_v57 = vsel %vm735_vm15, %v742_v30, %v744_v21  ;;  %v748_v56 = vsel %vm736_vm0, %v730_v25, %v747_v16  ;;  %v20_v63 = vadd.s32 64, %v3723_v1 }
  0xa2   :  { %5717 = vst [vmem:[#allocation6_spill] sm:$0xff] %v4314_v29  ;;  %vm3461_vm1 = vcmp.lt.s32.totalorder %v3460_v9, 0  ;;  %v749_v0 = vsel %vm735_vm15, %v746_v18, %v748_v56  ;;  %v4323_v41 = vmul.u32.u64.low %v4295_v19, %v745_v57  ;;  %v4324_v31 = vmul.u32.u64.high %v4295_v19, %v745_v57, %v4323_v41 }
  0xa3   :  { %v670_v50 = vsel %vm3461_vm1, 0, %v3460_v9  ;;  %v4327_v23 = vmul.u32.u64.low %v4295_v19, %v749_v0  ;;  %v4328_v33 = vmul.u32.u64.high %v4295_v19, %v749_v0, %v4327_v23  ;;  %v808_v25 = vand.u32 2139095040, %v4314_v29 }
  0xa4   :  { %v671_v39 = vsub.s32 32, %v670_v50  ;;  %v672_v5 = vshll.u32 %v4292_v35, %v670_v50  ;;  %v675_v15 = vsub.s32 4294967266, %v670_v50  ;;  %vm588_vm6 = vweird.f32 %v3855_v47 }
  0xa5   :  { %vm590_vm7 = vcmp.lt.s32.totalorder %v4290_v37, 2  ;;  %vm591_vm8 = vcmp.eq.s32.totalorder %v4290_v37, 0  ;;  %v757_v60 = vmul.u32 %v4295_v19, %v741_v32  ;;  %v760_v20 = vadd.s32 1, %v4324_v31 }
  0xa6   :  { %v673_v51 = vshrl.u32 %v655_v28, %v671_v39  ;;  %v676_v8 = vadd.s32 127, %v675_v15  ;;  %v809_v10 = vshrl.u32 %v808_v25, 23  ;;  %vm594_vm9 = vcmp.eq.s32.totalorder %v4290_v37, 2 }
  0xa7   :  { %v4338_v62 = vpop.eup %3652  ;;  %v685_v35 = vsub.s32 4, %v4274_v36  ;;  %vm759_vm10 = vc.u32 %v4328_v33, %v4323_v41  ;;  %v53_v30 = vcvt.s32.f32 %v20_v63  ;;  %v5623_v32 = vand.u32 2147483647, %v4314_v29 }
  0xa8   :  { %5718 = vst [vmem:[#allocation7_spill] sm:$0xff] %v4338_v62  ;;  %v4343_v34 = vpop.eup %3654  ;;  %v5618_v18 = vxor.u32 2147483648, %v4338_v62  ;;  %v674_v9 = vor.u32 %v673_v51, %v672_v5  ;;  %v677_v19 = vshll.u32 %v676_v8, 23  ;;  %v761_v21 = vsel %vm759_vm10, %v760_v20, %v4324_v31 }
  0xa9   :  { %5719 = vst [vmem:[#allocation8_spill] sm:$0xff] %v4343_v34  ;;  %v5619_v16 = vxor.u32 2147483648, %v4343_v34  ;;  %v762_v28 = vadd.s32 %v761_v21, %v757_v60  ;;  %v3466_v57 = vadd.s32 4294967169, %v809_v10  ;;  %vm601_vm11 = vcmp.lt.s32.totalorder %v3858_v49, 0 }
  0xaa   :  { %v596_v56 = vsel %vm594_vm9, %v5618_v18, %v4343_v34  ;;  %v678_v0 = vor.u32 4788187, %v677_v19  ;;  %v681_v50 = vcvt.s32.f32 %v674_v9  ;;  %v4359_v39 = vmul.f32 %v4311_v3, %v53_v30 }
  0xab   :  { %v593_v31 = vsel %vm591_vm8, %v4338_v62, %v5619_v16  ;;  %v763_v23 = vadd.s32 536870912, %v762_v28  ;;  %v815_v63 = vadd.s32 1, %v3466_v57  ;;  %v686_v25 = vsel %vm601_vm11, %v685_v35, %v4274_v36 }
  0xac   :  { %5720 = vst [vmem:[#allocation9_spill] sm:$0xff] %v4359_v39  ;;  %v597_v5 = vsel %vm590_vm7, %v593_v31, %v596_v56  ;;  %v679_v15 = vand.u32 2147483647, %v678_v0  ;;  %v4367_v60 = vadd.s32 72, %v3723_v1  ;;  %v812_v20 = vand.u32 8388607, %v5623_v32 }
  0xad   :  { %v598_v51 = vsel %vm588_vm6, nan, %v597_v5  ;;  %v4371_v8 = vshrl.u32 %v763_v23, 30  ;;  %vm816_vm14 = vcmp.gt.s32.totalorder %v815_v63, 0  ;;  %vm4381_vm15 = vcmp.le.f32.partialorder %v599_v24, 0.7853982 }
  0xae   :  { %1737 = vst.msk [vmem:[%s5610_s1 + $0x20] sm:$0xff] %vm1732_vm13, %v598_v51  ;;  %v682_v37 = vmul.f32 %v681_v50, %v679_v15  ;;  %v817_v10 = vsel %vm816_vm14, %v815_v63, 0  ;;  %v4387_v35 = vsel %vm4381_vm15, 0, %v686_v25  ;;  %v911_v19 = vand.u32 2139095040, %v4359_v39 }
  0xaf   :  { %v765_v30 = vshll.u32 %v4371_v8, 30  ;;  %v819_v9 = vand.u32 31, %v817_v10  ;;  %v4392_v57 = vand.u32 3, %v4387_v35  ;;  %v4395_v24 = vadd.s32 %v4323_v41, %v4328_v33 }
  0xb0   :  { %v683_v21 = vxor.u32 2147483648, %v682_v37  ;;  %v813_v50 = vor.u32 8388608, %v812_v20  ;;  %v5622_v23 = vand.u32 2147483647, %v4359_v39  ;;  %v912_v51 = vshrl.u32 %v911_v19, 23 }
  0xb1   :  { %v4398_v0 = vsub.s32 %v762_v28, %v765_v30  ;;  %v820_v31 = vsub.s32 32, %v819_v9  ;;  %v822_v5 = vshll.u32 %v5637_v40, %v819_v9  ;;  %v825_v15 = vshll.u32 %v5640_v42, %v819_v9 }
  0xb2   :  { %v684_v63 = vsel %vm601_vm11, %v683_v21, %v682_v37  ;;  %v828_v25 = vshll.u32 %v5630_v44, %v819_v9  ;;  %v818_v28 = vshrl.u32 %v817_v10, 5  ;;  %v4414_v18 = vshll.u32 %v813_v50, 8 }
  0xb3   :  { %v687_v41 = vsel %vm4381_vm15, %v3858_v49, %v684_v63  ;;  %v768_v33 = vsub.s32 0, %v4398_v0  ;;  %v823_v20 = vshrl.u32 %v5640_v42, %v820_v31  ;;  %v826_v30 = vshrl.u32 %v5630_v44, %v820_v31 }
  0xb4   :  { %3656 = vcosq.f32 %v687_v41  ;;  %v829_v37 = vshrl.u32 %v5632_v46, %v820_v31  ;;  %v4418_v36 = vand.u32 8388607, %v5622_v23  ;;  %vm697_vm0 = vcmp.eq.s32.totalorder %v4392_v57, 2 }
  0xb5   :  { %3658 = vsinq.f32 %v687_v41  ;;  %v3463_v21 = vmin.u32 %v768_v33, %v4398_v0  ;;  %v821_v10 = vshrl.u32 %v5637_v40, %v820_v31  ;;  %v824_v19 = vor.u32 %v823_v20, %v822_v5 }
  0xb6   :  { %v827_v63 = vor.u32 %v826_v30, %v825_v15  ;;  %v830_v16 = vor.u32 %v829_v37, %v828_v25  ;;  %vm694_vm5 = vcmp.eq.s32.totalorder %v4392_v57, 0  ;;  %v831_v41 = vshll.u32 %v5632_v46, %v819_v9 }
  0xb7   :  { %v770_v54 = vclz %v3463_v21  ;;  %v832_v33 = vshrl.u32 %v5626_v48, %v820_v31  ;;  %v834_v50 = vshll.u32 %v5626_v48, %v819_v9  ;;  %vm693_vm1 = vcmp.lt.s32.totalorder %v4392_v57, 2 }
  0xb8   :  { %v835_v61 = vshrl.u32 %v5624_v55, %v820_v31  ;;  %vm837_vm7 = vcmp.lt.s32.totalorder %v818_v28, 1  ;;  %vm838_vm8 = vcmp.lt.s32.totalorder %v818_v28, 2  ;;  %v3470_v23 = vadd.s32 4294967169, %v912_v51 }
  0xb9   :  { %vm5700_vm9 = vweird.f32 %v3858_v49  ;;  %v3464_v5 = vadd.s32 4294967294, %v770_v54  ;;  %v833_v15 = vor.u32 %v832_v33, %v831_v41  ;;  %vm839_vm10 = vcmp.lt.s32.totalorder %v818_v28, 3 }
  0xba   :  { %vm840_vm11 = vcmp.lt.s32.totalorder %v818_v28, 4  ;;  %v836_v25 = vor.u32 %v835_v61, %v834_v50  ;;  %v841_v20 = vsel %vm837_vm7, %v821_v10, %v824_v19  ;;  %v845_v37 = vsel %vm837_vm7, %v824_v19, %v827_v63 }
  0xbb   :  { %v842_v30 = vsel %vm840_vm11, %v830_v16, 2102212464  ;;  %vm3465_vm14 = vcmp.lt.s32.totalorder %v3464_v5, 0  ;;  %v846_v21 = vsel %vm840_vm11, %v833_v15, 920167782  ;;  %v849_v32 = vsel %vm837_vm7, %v827_v63, %v830_v16 }
  0xbc   :  { %v843_v9 = vsel %vm839_vm10, %v827_v63, %v842_v30  ;;  %v773_v56 = vsel %vm3465_vm14, 0, %v3464_v5  ;;  %v847_v31 = vsel %vm839_vm10, %v830_v16, %v846_v21  ;;  %v850_v55 = vsel %vm840_vm11, %v836_v25, 1326507024 }
  0xbd   :  { %v918_v51 = vadd.s32 1, %v3470_v23  ;;  %v774_v48 = vsub.s32 32, %v773_v56  ;;  %v775_v54 = vshll.u32 %v4398_v0, %v773_v56  ;;  %v778_v41 = vsub.s32 4294967266, %v773_v56 }
  0xbe   :  { %v848_v33 = vsel %vm838_vm8, %v845_v37, %v847_v31  ;;  %v4433_v61 = vpop.eup %3656  ;;  %v844_v10 = vsel %vm838_vm8, %v841_v20, %v843_v9  ;;  %v851_v19 = vsel %vm839_vm10, %v833_v15, %v850_v55  ;;  %vm704_vm15 = vcmp.lt.s32.totalorder %v4191_v59, 0 }
  0xbf   :  { %5723 = vst [vmem:[#allocation10_spill] sm:$0xff] %v4433_v61  ;;  %v4438_v50 = vmul.u32.u64.low %v4414_v18, %v848_v33  ;;  %v4439_v63 = vmul.u32.u64.high %v4414_v18, %v848_v33, %v4438_v50  ;;  %v4442_v16 = vpop.eup %3658  ;;  %v5628_v23 = vxor.u32 2147483648, %v4433_v61  ;;  %v776_v56 = vshrl.u32 %v4395_v24, %v774_v48 }
  0xc0   :  { %5724 = vst [vmem:[#allocation11_spill] sm:$0xff] %v4442_v16  ;;  %v779_v0 = vadd.s32 127, %v778_v41  ;;  %v852_v5 = vsel %vm838_vm8, %v849_v32, %v851_v19  ;;  %v5629_v25 = vxor.u32 2147483648, %v4442_v16  ;;  %vm919_vm7 = vcmp.gt.s32.totalorder %v918_v51, 0 }
  0xc1   :  { %v4450_v55 = vmul.u32.u64.low %v4414_v18, %v852_v5  ;;  %v4451_v15 = vmul.u32.u64.high %v4414_v18, %v852_v5, %v4450_v55  ;;  %v699_v20 = vsel %vm697_vm0, %v5628_v23, %v4442_v16  ;;  %vm4460_vm10 = vcmp.le.f32.partialorder %v702_v2, 0.7853982 }
  0xc2   :  { %v777_v32 = vor.u32 %v776_v56, %v775_v54  ;;  %v780_v24 = vshll.u32 %v779_v0, 23  ;;  %v920_v28 = vsel %vm919_vm7, %v918_v51, 0  ;;  %v696_v30 = vsel %vm694_vm5, %v4433_v61, %v5629_v25 }
  0xc3   :  { %v860_v37 = vmul.u32 %v4414_v18, %v844_v10  ;;  %v863_v9 = vadd.s32 1, %v4439_v63  ;;  %v922_v21 = vand.u32 31, %v920_v28  ;;  %v700_v2 = vsel %vm693_vm1, %v696_v30, %v699_v20 }
  0xc4   :  { %v781_v31 = vor.u32 4788187, %v780_v24  ;;  %v784_v41 = vcvt.s32.f32 %v777_v32  ;;  %v788_v54 = vsub.s32 4, %v4371_v8  ;;  %v701_v51 = vsel %vm5700_vm9, nan, %v700_v2 }
  0xc5   :  { %vm862_vm0 = vc.u32 %v4451_v15, %v4438_v50  ;;  %v916_v33 = vor.u32 8388608, %v4418_v36  ;;  %v923_v19 = vsub.s32 32, %v922_v21  ;;  %1738 = vst.msk [vmem:[%s5610_s1 + $0x28] sm:$0xff] %vm1732_vm13, %v701_v51  ;;  %v925_v10 = vshll.u32 %v5637_v40, %v922_v21 }
  0xc6   :  { %v782_v18 = vand.u32 2147483647, %v781_v31  ;;  %v864_v57 = vsel %vm862_vm0, %v863_v9, %v4439_v63  ;;  %v928_v56 = vshll.u32 %v5640_v42, %v922_v21  ;;  %v921_v5 = vshrl.u32 %v920_v28, 5 }
  0xc7   :  { %v865_v0 = vadd.s32 %v864_v57, %v860_v37  ;;  %v926_v55 = vshrl.u32 %v5640_v42, %v923_v19  ;;  %v929_v20 = vshrl.u32 %v5630_v44, %v923_v19  ;;  %v931_v32 = vshll.u32 %v5630_v44, %v922_v21 }
  0xc8   :  { %v785_v36 = vmul.f32 %v784_v41, %v782_v18  ;;  %v932_v24 = vshrl.u32 %v5632_v46, %v923_v19  ;;  %v934_v30 = vshll.u32 %v5632_v46, %v922_v21  ;;  %v789_v63 = vsel %vm704_vm15, %v788_v54, %v4371_v8 }
  0xc9   :  { %v866_v9 = vadd.s32 536870912, %v865_v0  ;;  %v927_v2 = vor.u32 %v926_v55, %v925_v10  ;;  %v5727_v31 = vmov 920167782   ;;  %v930_v51 = vor.u32 %v929_v20, %v928_v56 }
  0xca   :  { %v935_v37 = vshrl.u32 %v5727_v31, %v923_v19  ;;  %v786_v28 = vxor.u32 2147483648, %v785_v36  ;;  %v937_v57 = vshll.u32 %v5727_v31, %v922_v21  ;;  %v5728_v23 = vmov 1326507024  }
  0xcb   :  { %v938_v41 = vshrl.u32 %v5728_v23, %v923_v19  ;;  %v867_v18 = vshrl.u32 %v866_v9, 30  ;;  %vm940_vm5 = vcmp.lt.s32.totalorder %v921_v5, 1  ;;  %v4497_v44 = vshll.u32 %v916_v33, 8 }
  0xcc   :  { %v936_v25 = vor.u32 %v935_v37, %v934_v30  ;;  %v787_v46 = vsel %vm704_vm15, %v786_v28, %v785_v36  ;;  %v924_v8 = vshrl.u32 %v5637_v40, %v923_v19  ;;  %v933_v54 = vor.u32 %v932_v24, %v931_v32 }
  0xcd   :  { %vm943_vm1 = vcmp.lt.s32.totalorder %v921_v5, 4  ;;  %v790_v10 = vsel %vm4460_vm10, %v4191_v59, %v787_v46  ;;  %v868_v56 = vshll.u32 %v867_v18, 30  ;;  %v939_v21 = vor.u32 %v938_v41, %v937_v57 }
  0xce   :  { %vm942_vm8 = vcmp.lt.s32.totalorder %v921_v5, 3  ;;  %3660 = vcosq.f32 %v790_v10  ;;  %vm941_vm11 = vcmp.lt.s32.totalorder %v921_v5, 2  ;;  %v948_v55 = vsel %vm940_vm5, %v927_v2, %v930_v51 }
  0xcf   :  { %v949_v33 = vsel %vm943_vm1, %v936_v25, 920167782  ;;  %3662 = vsinq.f32 %v790_v10  ;;  %v4507_v20 = vsub.s32 %v865_v0, %v868_v56  ;;  %v945_v19 = vsel %vm943_vm1, %v933_v54, 2102212464 }
  0xd0   :  { %v4512_v36 = vsel %vm4460_vm10, 0, %v789_v63  ;;  %v944_v46 = vsel %vm940_vm5, %v924_v8, %v927_v2  ;;  %v950_v32 = vsel %vm942_vm8, %v933_v54, %v949_v33  ;;  %v5729_v24 = vcvt.s32.f32 %v4367_v60 }
  0xd1   :  { %v871_v9 = vsub.s32 0, %v4507_v20  ;;  %v951_v0 = vsel %vm941_vm11, %v948_v55, %v950_v32  ;;  %v952_v37 = vsel %vm940_vm5, %v930_v51, %v933_v54  ;;  %v953_v28 = vsel %vm943_vm1, %v939_v21, 1326507024 }
  0xd2   :  { %v4519_v30 = vmul.f32 %v4311_v3, %v5729_v24  ;;  %v946_v48 = vsel %vm942_vm8, %v930_v51, %v945_v19  ;;  %v954_v63 = vsel %vm942_vm8, %v936_v25, %v953_v28  ;;  %v795_v60 = vand.u32 3, %v4512_v36 }
  0xd3   :  { %v4528_v2 = vmul.u32.u64.low %v4497_v44, %v951_v0  ;;  %v4529_v57 = vmul.u32.u64.high %v4497_v44, %v951_v0, %v4528_v2  ;;  %v3467_v41 = vmin.u32 %v871_v9, %v4507_v20  ;;  %v891_v8 = vsub.s32 4, %v867_v18 }
  0xd4   :  { %5730 = vst [vmem:[#allocation12_spill] sm:$0xff] %v4519_v30  ;;  %v955_v10 = vsel %vm941_vm11, %v952_v37, %v954_v63  ;;  %v1014_v54 = vand.u32 2139095040, %v4519_v30  ;;  %v947_v21 = vsel %vm941_vm11, %v944_v46, %v946_v48  ;;  %vm5659_vm14 = vweird.f32 %v4191_v59 }
  0xd5   :  { %v873_v56 = vclz %v3467_v41  ;;  %v4538_v51 = vmul.u32.u64.low %v4497_v44, %v955_v10  ;;  %v4539_v25 = vmul.u32.u64.high %v4497_v44, %v955_v10, %v4538_v51  ;;  %vm807_vm15 = vcmp.lt.s32.totalorder %v4314_v29, 0 }
  0xd6   :  { %v966_v55 = vadd.s32 1, %v4529_v57  ;;  %v1015_v33 = vshrl.u32 %v1014_v54, 23  ;;  %vm796_vm7 = vcmp.lt.s32.totalorder %v795_v60, 2  ;;  %vm797_vm10 = vcmp.eq.s32.totalorder %v795_v60, 0 }
  0xd7   :  { %vm800_vm0 = vcmp.eq.s32.totalorder %v795_v60, 2  ;;  %v3468_v19 = vadd.s32 4294967294, %v873_v56  ;;  %v861_v5 = vadd.s32 %v4438_v50, %v4451_v15  ;;  %v963_v46 = vmul.u32 %v4497_v44, %v947_v21 }
  0xd8   :  { %v4544_v32 = vpop.eup %3660  ;;  %v5636_v24 = vand.u32 2147483647, %v4519_v30  ;;  %v3474_v9 = vadd.s32 4294967169, %v1015_v33  ;;  %v892_v28 = vsel %vm807_vm15, %v891_v8, %v867_v18  ;;  %vm965_vm1 = vc.u32 %v4539_v25, %v4528_v2 }
  0xd9   :  { %5731 = vst [vmem:[#allocation13_spill] sm:$0xff] %v4544_v32  ;;  %v4550_v0 = vpop.eup %3662  ;;  %v5634_v37 = vxor.u32 2147483648, %v4544_v32  ;;  %vm3469_vm5 = vcmp.lt.s32.totalorder %v3468_v19, 0  ;;  %v967_v50 = vsel %vm965_vm1, %v966_v55, %v4529_v57  ;;  %v2154_v6 = vadd.s32 3, %v4209_v14 }
  0xda   :  { %5732 = vst [vmem:[#allocation14_spill] sm:$0xff] %v4550_v0  ;;  %v5635_v48 = vxor.u32 2147483648, %v4550_v0  ;;  %v876_v63 = vsel %vm3469_vm5, 0, %v3468_v19  ;;  %v1021_v44 = vadd.s32 1, %v3474_v9  ;;  %v968_v8 = vadd.s32 %v967_v50, %v963_v46 }
  0xdb   :  { %v802_v15 = vsel %vm800_vm0, %v5634_v37, %v4550_v0  ;;  %v877_v41 = vsub.s32 32, %v876_v63  ;;  %v878_v10 = vshll.u32 %v4507_v20, %v876_v63  ;;  %v881_v54 = vsub.s32 4294967266, %v876_v63 }
  0xdc   :  { %v799_v18 = vsel %vm797_vm10, %v4544_v32, %v5635_v48  ;;  %v1018_v56 = vand.u32 8388607, %v5636_v24  ;;  %vm1022_vm8 = vcmp.gt.s32.totalorder %v1021_v44, 0  ;;  %v969_v20 = vadd.s32 536870912, %v968_v8 }
  0xdd   :  { %v803_v57 = vsel %vm796_vm7, %v799_v18, %v802_v15  ;;  %v879_v21 = vshrl.u32 %v861_v5, %v877_v41  ;;  %v882_v51 = vadd.s32 127, %v881_v54  ;;  %v1023_v55 = vsel %vm1022_vm8, %v1021_v44, 0 }
  0xde   :  { %v804_v33 = vsel %vm5659_vm14, nan, %v803_v57  ;;  %v1025_v19 = vand.u32 31, %v1023_v55  ;;  %v5733_v46 = vand.u32 2147483647, %v4314_v29  ;;  %v4587_v50 = vshrl.u32 %v969_v20, 30 }
  0xdf   :  { %1739 = vst.msk [vmem:[%s5610_s1 + $0x30] sm:$0xff] %vm1732_vm13, %v804_v33  ;;  %v880_v60 = vor.u32 %v879_v21, %v878_v10  ;;  %v883_v5 = vshll.u32 %v882_v51, 23  ;;  %v1019_v54 = vor.u32 8388608, %v1018_v56  ;;  %v1024_v18 = vshrl.u32 %v1023_v55, 5 }
  0xe0   :  { %vm4579_vm11 = vcmp.le.f32.partialorder %v5733_v46, 0.7853982  ;;  %v1026_v44 = vsub.s32 32, %v1025_v19  ;;  %v971_v57 = vshll.u32 %v4587_v50, 30  ;;  %v1028_v33 = vshll.u32 %v5637_v40, %v1025_v19 }
  0xe1   :  { %v4585_v63 = vsel %vm4579_vm11, 0, %v892_v28  ;;  %v884_v15 = vor.u32 4788187, %v883_v5  ;;  %v887_v41 = vcvt.s32.f32 %v880_v60  ;;  %v1031_v10 = vshll.u32 %v5640_v42, %v1025_v19 }
  0xe2   :  { %5736 = vst [vmem:[#allocation15_spill] sm:$0xff] %v4585_v63  ;;  %v1029_v46 = vshrl.u32 %v5640_v42, %v1026_v44  ;;  %v5737_v51 = vmov 2131351028   ;;  %v5738_v28 = vmov 2102212464   ;;  %v1038_v20 = vshrl.u32 %v5727_v31, %v1026_v44 }
  0xe3   :  { %v885_v21 = vand.u32 2147483647, %v884_v15  ;;  %v1032_v37 = vshrl.u32 %v5737_v51, %v1026_v44  ;;  %v1037_v48 = vshll.u32 %v5738_v28, %v1025_v19  ;;  %v4596_v24 = vsub.s32 %v968_v8, %v971_v57 }
  0xe4   :  { %v1034_v56 = vshll.u32 %v5737_v51, %v1025_v19  ;;  %v1035_v55 = vshrl.u32 %v5738_v28, %v1026_v44  ;;  %v22_v60 = vadd.s32 80, %v3723_v1  ;;  %v1040_v40 = vshll.u32 %v5727_v31, %v1025_v19 }
  0xe5   :  { %v888_v5 = vmul.f32 %v887_v41, %v885_v21  ;;  %v4602_v59 = vshll.u32 %v1019_v54, 8  ;;  %v4605_v15 = vadd.s32 88, %v3723_v1  ;;  %v974_v42 = vsub.s32 0, %v4596_v24 }
  0xe6   :  { %v1030_v49 = vor.u32 %v1029_v46, %v1028_v33  ;;  %v1033_v32 = vor.u32 %v1032_v37, %v1031_v10  ;;  %v1041_v8 = vshrl.u32 %v5728_v23, %v1026_v44  ;;  %v5739_v0 = vmov 683565275  }
  0xe7   :  { %v889_v57 = vxor.u32 2147483648, %v888_v5  ;;  %v1027_v47 = vshrl.u32 %v5739_v0, %v1026_v44  ;;  %v1039_v61 = vor.u32 %v1038_v20, %v1037_v48  ;;  %vm1043_vm7 = vcmp.lt.s32.totalorder %v1024_v18, 1 }
  0xe8   :  { %v3471_v41 = vmin.u32 %v974_v42, %v4596_v24  ;;  %v1036_v21 = vor.u32 %v1035_v55, %v1034_v56  ;;  %vm1044_vm10 = vcmp.lt.s32.totalorder %v1024_v18, 2  ;;  %v55_v19 = vcvt.s32.f32 %v22_v60 }
  0xe9   :  { %v890_v54 = vsel %vm807_vm15, %v889_v57, %v888_v5  ;;  %v1042_v16 = vor.u32 %v1041_v8, %v1040_v40  ;;  %vm1045_vm0 = vcmp.lt.s32.totalorder %v1024_v18, 3  ;;  %vm1046_vm5 = vcmp.lt.s32.totalorder %v1024_v18, 4 }
  0xea   :  { %v893_v37 = vsel %vm4579_vm11, %v4314_v29, %v890_v54  ;;  %v976_v33 = vclz %v3471_v41  ;;  %v1048_v46 = vsel %vm1046_vm5, %v1036_v21, 2102212464  ;;  %v1051_v48 = vsel %vm1043_vm7, %v1030_v49, %v1033_v32 }
  0xeb   :  { %3664 = vcosq.f32 %v893_v37  ;;  %v1047_v42 = vsel %vm1043_vm7, %v1027_v47, %v1030_v49  ;;  %v1049_v44 = vsel %vm1045_vm0, %v1033_v32, %v1048_v46  ;;  %v1052_v10 = vsel %vm1046_vm5, %v1039_v61, 920167782 }
  0xec   :  { %3666 = vsinq.f32 %v893_v37  ;;  %v3472_v20 = vadd.s32 4294967294, %v976_v33  ;;  %v1053_v40 = vsel %vm1045_vm0, %v1036_v21, %v1052_v10  ;;  %v1055_v56 = vsel %vm1043_vm7, %v1033_v32, %v1036_v21 }
  0xed   :  { %v964_v9 = vadd.s32 %v4528_v2, %v4539_v25  ;;  %v1054_v55 = vsel %vm1044_vm10, %v1051_v48, %v1053_v40  ;;  %v1056_v60 = vsel %vm1046_vm5, %v1042_v16, 1326507024  ;;  %v4625_v5 = vmul.f32 %v4311_v3, %v55_v19 }
  0xee   :  { %vm3473_vm15 = vcmp.lt.s32.totalorder %v3472_v20, 0  ;;  %v1057_v47 = vsel %vm1045_vm0, %v1039_v61, %v1056_v60  ;;  %v4629_v49 = vmul.u32.u64.low %v4602_v59, %v1054_v55  ;;  %v4630_v8 = vmul.u32.u64.high %v4602_v59, %v1054_v55, %v4629_v49 }
  0xef   :  { %5740 = vst [vmem:[#allocation16_spill] sm:$0xff] %v4625_v5  ;;  %v898_v57 = vand.u32 3, %v4585_v63  ;;  %v979_v32 = vsel %vm3473_vm15, 0, %v3472_v20  ;;  %v1050_v41 = vsel %vm1044_vm10, %v1047_v42, %v1049_v44  ;;  %v1058_v2 = vsel %vm1044_vm10, %v1055_v56, %v1057_v47 }
  0xf0   :  { %v980_v25 = vsub.s32 32, %v979_v32  ;;  %v981_v16 = vshll.u32 %v4596_v24, %v979_v32  ;;  %v984_v21 = vsub.s32 4294967266, %v979_v32  ;;  %v1117_v19 = vand.u32 2139095040, %v4625_v5 }
  0xf1   :  { %v4639_v61 = vmul.u32.u64.low %v4602_v59, %v1058_v2  ;;  %v4640_v54 = vmul.u32.u64.high %v4602_v59, %v1058_v2, %v4639_v61  ;;  %v56_v37 = vcvt.s32.f32 %v4605_v15  ;;  %v1069_v48 = vadd.s32 1, %v4630_v8 }
  0xf2   :  { %v982_v33 = vshrl.u32 %v964_v9, %v980_v25  ;;  %v985_v46 = vadd.s32 127, %v984_v21  ;;  %v1118_v10 = vshrl.u32 %v1117_v19, 23  ;;  %vm900_vm1 = vcmp.eq.s32.totalorder %v898_v57, 0 }
  0xf3   :  { %vm910_vm8 = vcmp.lt.s32.totalorder %v4359_v39, 0  ;;  %v1066_v18 = vmul.u32 %v4602_v59, %v1050_v41  ;;  %v994_v44 = vsub.s32 4, %v4587_v50  ;;  %vm903_vm11 = vcmp.eq.s32.totalorder %v898_v57, 2 }
  0xf4   :  { %v983_v24 = vor.u32 %v982_v33, %v981_v16  ;;  %v986_v42 = vshll.u32 %v985_v46, 23  ;;  %v3478_v20 = vadd.s32 4294967169, %v1118_v10  ;;  %vm1068_vm7 = vc.u32 %v4640_v54, %v4629_v49 }
  0xf5   :  { %v4647_v40 = vpop.eup %3664  ;;  %v5654_v15 = vand.u32 2147483647, %v4625_v5  ;;  %v4653_v56 = vmul.f32 %v4311_v3, %v56_v37  ;;  %v1070_v47 = vsel %vm1068_vm7, %v1069_v48, %v4630_v8  ;;  %vm899_vm10 = vcmp.lt.s32.totalorder %v898_v57, 2 }
  0xf6   :  { %5741 = vst [vmem:[#allocation17_spill] sm:$0xff] %v4647_v40  ;;  %v4655_v9 = vpop.eup %3666  ;;  %v5652_v59 = vxor.u32 2147483648, %v4647_v40  ;;  %v987_v55 = vor.u32 4788187, %v986_v42  ;;  %v990_v60 = vcvt.s32.f32 %v983_v24  ;;  %v1071_v41 = vadd.s32 %v1070_v47, %v1066_v18 }
  0xf7   :  { %5742 = vst [vmem:[#allocation18_spill] sm:$0xff] %v4653_v56  ;;  %5743 = vst [vmem:[#allocation19_spill] sm:$0xff] %v4655_v9  ;;  %v5653_v32 = vxor.u32 2147483648, %v4655_v9  ;;  %v1124_v2 = vadd.s32 1, %v3478_v20  ;;  %vm5658_vm0 = vweird.f32 %v4314_v29  ;;  %v995_v16 = vsel %vm910_vm8, %v994_v44, %v4587_v50 }
  0xf8   :  { %v905_v3 = vsel %vm903_vm11, %v5652_v59, %v4655_v9  ;;  %v988_v25 = vand.u32 2147483647, %v987_v55  ;;  %v1072_v21 = vadd.s32 536870912, %v1071_v41  ;;  %v1121_v19 = vand.u32 8388607, %v5654_v15 }
  0xf9   :  { %v902_v8 = vsel %vm900_vm1, %v4647_v40, %v5653_v32  ;;  %vm1125_vm5 = vcmp.gt.s32.totalorder %v1124_v2, 0  ;;  %v1220_v46 = vand.u32 2139095040, %v4653_v56  ;;  %v5744_v50 = vand.u32 2147483647, %v4359_v39 }
  0xfa   :  { %v906_v61 = vsel %vm899_vm10, %v902_v8, %v905_v3  ;;  %v991_v37 = vmul.f32 %v990_v60, %v988_v25  ;;  %v1126_v33 = vsel %vm1125_vm5, %v1124_v2, 0  ;;  %v4678_v10 = vshrl.u32 %v1072_v21, 30 }
  0xfb   :  { %v907_v48 = vsel %vm5658_vm0, nan, %v906_v61  ;;  %vm909_vm15 = vcmp.le.f32.partialorder %v5744_v50, 0.7853982  ;;  %v1128_v57 = vand.u32 31, %v1126_v33  ;;  %v1122_v20 = vor.u32 8388608, %v1121_v19 }
  0xfc   :  { %1740 = vst.msk [vmem:[%s5610_s1 + $0x38] sm:$0xff] %vm1732_vm13, %v907_v48  ;;  %v992_v18 = vxor.u32 2147483648, %v991_v37  ;;  %v4684_v24 = vsel %vm909_vm15, 0, %v995_v16  ;;  %v1074_v44 = vshll.u32 %v4678_v10, 30  ;;  %v5746_v2 = vmov 2475754826  }
  0xfd   :  { %5745 = vst [vmem:[#allocation20_spill] sm:$0xff] %v4684_v24  ;;  %v4687_v42 = vand.u32 3, %v4684_v24  ;;  %v1129_v55 = vsub.s32 32, %v1128_v57  ;;  %v1131_v47 = vshll.u32 %v5739_v0, %v1128_v57  ;;  %v1134_v3 = vshll.u32 %v5746_v2, %v1128_v57 }
  0xfe   :  { %v993_v60 = vsel %vm910_vm8, %v992_v18, %v991_v37  ;;  %v1221_v25 = vshrl.u32 %v1220_v46, 23  ;;  %v4695_v21 = vsub.s32 %v1071_v41, %v1074_v44  ;;  %v1127_v16 = vshrl.u32 %v1126_v33, 5 }
  0xff   :  { %v996_v8 = vsel %vm909_vm15, %v4359_v39, %v993_v60  ;;  %v1137_v61 = vshll.u32 %v5737_v51, %v1128_v57  ;;  %v1132_v48 = vshrl.u32 %v5746_v2, %v1129_v55  ;;  %v1135_v19 = vshrl.u32 %v5737_v51, %v1129_v55 }
 0x100   :  { %3668 = vcosq.f32 %v996_v8  ;;  %v1140_v50 = vshll.u32 %v5738_v28, %v1128_v57  ;;  %v1077_v37 = vsub.s32 0, %v4695_v21  ;;  %v1130_v18 = vshrl.u32 %v5739_v0, %v1129_v55 }
 0x101   :  { %3670 = vsinq.f32 %v996_v8  ;;  %v1138_v46 = vshrl.u32 %v5738_v28, %v1129_v55  ;;  %vm1006_vm1 = vcmp.eq.s32.totalorder %v4687_v42, 2  ;;  %v1133_v41 = vor.u32 %v1132_v48, %v1131_v47 }
 0x102   :  { %v1136_v33 = vor.u32 %v1135_v19, %v1134_v3  ;;  %v1141_v44 = vshrl.u32 %v5727_v31, %v1129_v55  ;;  %v1143_v60 = vshll.u32 %v5727_v31, %v1128_v57  ;;  %vm1003_vm8 = vcmp.eq.s32.totalorder %v4687_v42, 0 }
 0x103   :  { %v1067_v59 = vadd.s32 %v4629_v49, %v4640_v54  ;;  %v3475_v8 = vmin.u32 %v1077_v37, %v4695_v21  ;;  %v4711_v32 = vshll.u32 %v1122_v20, 8  ;;  %v3482_v15 = vadd.s32 4294967169, %v1221_v25 }
 0x104   :  { %vm1002_vm11 = vcmp.lt.s32.totalorder %v4687_v42, 2  ;;  %v1139_v29 = vor.u32 %v1138_v46, %v1137_v61  ;;  %v1142_v40 = vor.u32 %v1141_v44, %v1140_v50  ;;  %v1144_v47 = vshrl.u32 %v5728_v23, %v1129_v55 }
 0x105   :  { %vm1146_vm7 = vcmp.lt.s32.totalorder %v1127_v16, 1  ;;  %vm5699_vm10 = vweird.f32 %v4359_v39  ;;  %v1079_v57 = vclz %v3475_v8  ;;  %vm1147_vm5 = vcmp.lt.s32.totalorder %v1127_v16, 2 }
 0x106   :  { %vm1148_vm15 = vcmp.lt.s32.totalorder %v1127_v16, 3  ;;  %vm1149_vm0 = vcmp.lt.s32.totalorder %v1127_v16, 4  ;;  %v1145_v3 = vor.u32 %v1144_v47, %v1143_v60  ;;  %v1150_v49 = vsel %vm1146_vm7, %v1130_v18, %v1133_v41 }
 0x107   :  { %v1151_v54 = vsel %vm1149_vm0, %v1139_v29, 2102212464  ;;  %v1154_v48 = vsel %vm1146_vm7, %v1133_v41, %v1136_v33  ;;  %v3476_v20 = vadd.s32 4294967294, %v1079_v57  ;;  %v1155_v19 = vsel %vm1149_vm0, %v1142_v40, 920167782 }
 0x108   :  { %v1152_v25 = vsel %vm1148_vm15, %v1136_v33, %v1151_v54  ;;  %v1158_v37 = vsel %vm1146_vm7, %v1136_v33, %v1139_v29  ;;  %v1156_v61 = vsel %vm1148_vm15, %v1139_v29, %v1155_v19  ;;  %v1159_v50 = vsel %vm1149_vm0, %v1145_v3, 1326507024 }
 0x109   :  { %v5662_v55 = vand.u32 2147483647, %v4653_v56  ;;  %v1227_v46 = vadd.s32 1, %v3482_v15  ;;  %vm3477_vm14 = vcmp.lt.s32.totalorder %v3476_v20, 0  ;;  %v1153_v44 = vsel %vm1147_vm5, %v1150_v49, %v1152_v25 }
 0x10a   :  { %v1157_v8 = vsel %vm1147_vm5, %v1154_v48, %v1156_v61  ;;  %v1160_v18 = vsel %vm1148_vm15, %v1142_v40, %v1159_v50  ;;  %v4722_v60 = vpop.eup %3668  ;;  %v1082_v41 = vsel %vm3477_vm14, 0, %v3476_v20  ;;  %vm1013_vm0 = vcmp.lt.s32.totalorder %v4519_v30, 0 }
 0x10b   :  { %5747 = vst [vmem:[#allocation21_spill] sm:$0xff] %v4722_v60  ;;  %v1161_v47 = vsel %vm1147_vm5, %v1158_v37, %v1160_v18  ;;  %v4726_v33 = vmul.u32.u64.low %v4711_v32, %v1157_v8  ;;  %v4727_v57 = vmul.u32.u64.high %v4711_v32, %v1157_v8, %v4726_v33  ;;  %v4730_v29 = vpop.eup %3670  ;;  %v5660_v15 = vxor.u32 2147483648, %v4722_v60 }
 0x10c   :  { %5748 = vst [vmem:[#allocation22_spill] sm:$0xff] %v4730_v29  ;;  %v1083_v3 = vsub.s32 32, %v1082_v41  ;;  %v1084_v49 = vshll.u32 %v4695_v21, %v1082_v41  ;;  %v1087_v54 = vsub.s32 4294967266, %v1082_v41  ;;  %v5661_v40 = vxor.u32 2147483648, %v4730_v29 }
 0x10d   :  { %v4736_v48 = vmul.u32.u64.low %v4711_v32, %v1161_v47  ;;  %v4737_v20 = vmul.u32.u64.high %v4711_v32, %v1161_v47, %v4736_v48  ;;  %vm1228_vm14 = vcmp.gt.s32.totalorder %v1227_v46, 0  ;;  %v1008_v16 = vsel %vm1006_vm1, %v5660_v15, %v4730_v29 }
 0x10e   :  { %v1085_v25 = vshrl.u32 %v1067_v59, %v1083_v3  ;;  %v1088_v19 = vadd.s32 127, %v1087_v54  ;;  %v1229_v37 = vsel %vm1228_vm14, %v1227_v46, 0  ;;  %v1005_v21 = vsel %vm1003_vm8, %v4722_v60, %v5661_v40 }
 0x10f   :  { %v1169_v61 = vmul.u32 %v4711_v32, %v1153_v44  ;;  %v1172_v50 = vadd.s32 1, %v4727_v57  ;;  %v1231_v8 = vand.u32 31, %v1229_v37  ;;  %v1009_v18 = vsel %vm1002_vm11, %v1005_v21, %v1008_v16 }
 0x110   :  { %v5749_v59 = vand.u32 2147483647, %v4519_v30  ;;  %v1086_v41 = vor.u32 %v1085_v25, %v1084_v49  ;;  %v1089_v47 = vshll.u32 %v1088_v19, 23  ;;  %v4761_v3 = vadd.s32 96, %v3723_v1 }
 0x111   :  { %v1010_v32 = vsel %vm5699_vm10, nan, %v1009_v18  ;;  %vm1171_vm8 = vc.u32 %v4737_v20, %v4726_v33  ;;  %v1224_v42 = vand.u32 8388607, %v5662_v55  ;;  %v1232_v44 = vsub.s32 32, %v1231_v8 }
 0x112   :  { %vm4756_vm1 = vcmp.le.f32.partialorder %v5749_v59, 0.7853982  ;;  %1741 = vst.msk [vmem:[%s5610_s1 + $0x40] sm:$0xff] %vm1732_vm13, %v1010_v32  ;;  %v1090_v49 = vor.u32 4788187, %v1089_v47  ;;  %v1093_v54 = vcvt.s32.f32 %v1086_v41  ;;  %v1173_v48 = vsel %vm1171_vm8, %v1172_v50, %v4727_v57 }
 0x113   :  { %v1234_v16 = vshll.u32 %v5739_v0, %v1231_v8  ;;  %v1174_v25 = vadd.s32 %v1173_v48, %v1169_v61  ;;  %v1230_v19 = vshrl.u32 %v1229_v37, 5  ;;  %v1235_v21 = vshrl.u32 %v5746_v2, %v1232_v44 }
 0x114   :  { %v1237_v18 = vshll.u32 %v5746_v2, %v1231_v8  ;;  %v1091_v59 = vand.u32 2147483647, %v1090_v49  ;;  %v1238_v15 = vshrl.u32 %v5737_v51, %v1232_v44  ;;  %v1240_v40 = vshll.u32 %v5737_v51, %v1231_v8 }
 0x115   :  { %v1241_v55 = vshrl.u32 %v5738_v28, %v1232_v44  ;;  %v1175_v32 = vadd.s32 536870912, %v1174_v25  ;;  %v1225_v47 = vor.u32 8388608, %v1224_v42  ;;  %v1243_v41 = vshll.u32 %v5738_v28, %v1231_v8 }
 0x116   :  { %v1244_v57 = vshrl.u32 %v5727_v31, %v1232_v44  ;;  %v1094_v50 = vmul.f32 %v1093_v54, %v1091_v59  ;;  %v1236_v61 = vor.u32 %v1235_v21, %v1234_v16  ;;  %v1239_v37 = vor.u32 %v1238_v15, %v1237_v18 }
 0x117   :  { %v1246_v48 = vshll.u32 %v5727_v31, %v1231_v8  ;;  %v4783_v39 = vshrl.u32 %v1175_v32, 30  ;;  %v1247_v60 = vshrl.u32 %v5728_v23, %v1232_v44  ;;  %vm1249_vm11 = vcmp.lt.s32.totalorder %v1230_v19, 1 }
 0x118   :  { %v1245_v49 = vor.u32 %v1244_v57, %v1243_v41  ;;  %v1095_v29 = vxor.u32 2147483648, %v1094_v50  ;;  %v1097_v9 = vsub.s32 4, %v4678_v10  ;;  %v1242_v24 = vor.u32 %v1241_v55, %v1240_v40 }
 0x119   :  { %vm1252_vm7 = vcmp.lt.s32.totalorder %v1230_v19, 4  ;;  %v1177_v42 = vshll.u32 %v4783_v39, 30  ;;  %vm1250_vm5 = vcmp.lt.s32.totalorder %v1230_v19, 2  ;;  %vm1251_vm15 = vcmp.lt.s32.totalorder %v1230_v19, 3 }
 0x11a   :  { %v4788_v54 = vshll.u32 %v1225_v47, 8  ;;  %v1096_v15 = vsel %vm1013_vm0, %v1095_v29, %v1094_v50  ;;  %v1248_v8 = vor.u32 %v1247_v60, %v1246_v48  ;;  %v1257_v16 = vsel %vm1249_vm11, %v1236_v61, %v1239_v37 }
 0x11b   :  { %v1258_v21 = vsel %vm1252_vm7, %v1245_v49, 920167782  ;;  %v1099_v18 = vsel %vm4756_vm1, %v4519_v30, %v1096_v15  ;;  %v4797_v55 = vsub.s32 %v1174_v25, %v1177_v42  ;;  %v1233_v40 = vshrl.u32 %v5739_v0, %v1232_v44 }
 0x11c   :  { %v57_v59 = vcvt.s32.f32 %v4761_v3  ;;  %v1098_v32 = vsel %vm1013_vm0, %v1097_v9, %v4678_v10  ;;  %3672 = vcosq.f32 %v1099_v18  ;;  %v1254_v60 = vsel %vm1252_vm7, %v1242_v24, 2102212464 }
 0x11d   :  { %v1259_v29 = vsel %vm1251_vm15, %v1242_v24, %v1258_v21  ;;  %3674 = vsinq.f32 %v1099_v18  ;;  %v1180_v47 = vsub.s32 0, %v4797_v55  ;;  %v25_v25 = vadd.s32 104, %v3723_v1 }
 0x11e   :  { %v1260_v41 = vsel %vm1250_vm5, %v1257_v16, %v1259_v29  ;;  %v1261_v44 = vsel %vm1249_vm11, %v1239_v37, %v1242_v24  ;;  %v1262_v3 = vsel %vm1252_vm7, %v1248_v8, 1326507024  ;;  %v4818_v9 = vsel %vm4756_vm1, 0, %v1098_v32  ;;  %v4828_v8 = vld [vmem:[%s5609_s0] ss:$0 sm:$0xff] }
 0x11f   :  { %v4812_v57 = vmul.u32.u64.low %v4788_v54, %v1260_v41  ;;  %v4813_v50 = vmul.u32.u64.high %v4788_v54, %v1260_v41, %v4812_v57  ;;  %5752 = vst [vmem:[#allocation23_spill] sm:$0xff] %v4818_v9  ;;  %v3479_v10 = vmin.u32 %v1180_v47, %v4797_v55  ;;  %v1253_v48 = vsel %vm1249_vm11, %v1233_v40, %v1236_v61 }
 0x120   :  { %v1255_v42 = vsel %vm1251_vm15, %v1239_v37, %v1254_v60  ;;  %v1104_v15 = vand.u32 3, %v4818_v9  ;;  %v1263_v24 = vsel %vm1251_vm15, %v1245_v49, %v1262_v3  ;;  %v4831_v16 = vmul.f32 %v4828_v8, %v57_v59 }
 0x121   :  { %v1182_v46 = vclz %v3479_v10  ;;  %v1264_v21 = vsel %vm1250_vm5, %v1261_v44, %v1263_v24  ;;  %v1256_v18 = vsel %vm1250_vm5, %v1253_v48, %v1255_v42  ;;  %v58_v40 = vcvt.s32.f32 %v25_v25 }
 0x122   :  { %v4836_v61 = vmul.u32.u64.low %v4788_v54, %v1264_v21  ;;  %v4837_v37 = vmul.u32.u64.high %v4788_v54, %v1264_v21, %v4836_v61  ;;  %vm5690_vm14 = vweird.f32 %v4519_v30  ;;  %vm1116_vm0 = vcmp.lt.s32.totalorder %v4625_v5, 0 }
 0x123   :  { %v3480_v49 = vadd.s32 4294967294, %v1182_v46  ;;  %v1323_v32 = vand.u32 2139095040, %v4831_v16  ;;  %vm1105_vm1 = vcmp.lt.s32.totalorder %v1104_v15, 2  ;;  %vm1106_vm8 = vcmp.eq.s32.totalorder %v1104_v15, 0 }
 0x124   :  { %vm1109_vm11 = vcmp.eq.s32.totalorder %v1104_v15, 2  ;;  %v1275_v59 = vadd.s32 1, %v4813_v50  ;;  %v1170_v19 = vadd.s32 %v4726_v33, %v4737_v20  ;;  %v1272_v60 = vmul.u32 %v4788_v54, %v1256_v18 }
 0x125   :  { %vm3481_vm7 = vcmp.lt.s32.totalorder %v3480_v49, 0  ;;  %v1324_v29 = vshrl.u32 %v1323_v32, 23  ;;  %v1200_v25 = vsub.s32 4, %v4783_v39  ;;  %vm1274_vm5 = vc.u32 %v4837_v37, %v4812_v57 }
 0x126   :  { %v4846_v47 = vpop.eup %3672  ;;  %v1185_v41 = vsel %vm3481_vm7, 0, %v3480_v49  ;;  %v4852_v44 = vmul.f32 %v4828_v8, %v58_v40  ;;  %v1276_v42 = vsel %vm1274_vm5, %v1275_v59, %v4813_v50  ;;  %v5673_v24 = vand.u32 2147483647, %v4831_v16 }
 0x127   :  { %5753 = vst [vmem:[#allocation24_spill] sm:$0xff] %v4846_v47  ;;  %v4854_v3 = vpop.eup %3674  ;;  %v5671_v10 = vxor.u32 2147483648, %v4846_v47  ;;  %v1186_v33 = vsub.s32 32, %v1185_v41  ;;  %v1187_v20 = vshll.u32 %v4797_v55, %v1185_v41  ;;  %v1190_v54 = vsub.s32 4294967266, %v1185_v41 }
 0x128   :  { %5754 = vst [vmem:[#allocation25_spill] sm:$0xff] %v4854_v3  ;;  %v5672_v48 = vxor.u32 2147483648, %v4854_v3  ;;  %v3486_v46 = vadd.s32 4294967169, %v1324_v29  ;;  %v1277_v40 = vadd.s32 %v1276_v42, %v1272_v60  ;;  %v5755_v49 = vand.u32 2147483647, %v4625_v5 }
 0x129   :  { %v1111_v21 = vsel %vm1109_vm11, %v5671_v10, %v4854_v3  ;;  %v1188_v18 = vshrl.u32 %v1170_v19, %v1186_v33  ;;  %v1191_v61 = vadd.s32 127, %v1190_v54  ;;  %v1201_v32 = vsel %vm1116_vm0, %v1200_v25, %v4783_v39 }
 0x12a   :  { %v1108_v55 = vsel %vm1106_vm8, %v4846_v47, %v5672_v48  ;;  %vm4871_vm15 = vcmp.le.f32.partialorder %v5755_v49, 0.7853982  ;;  %v1330_v59 = vadd.s32 1, %v3486_v46  ;;  %v1278_v41 = vadd.s32 536870912, %v1277_v40 }
 0x12b   :  { %v1112_v19 = vsel %vm1105_vm1, %v1108_v55, %v1111_v21  ;;  %v1189_v29 = vor.u32 %v1188_v18, %v1187_v20  ;;  %v1192_v60 = vshll.u32 %v1191_v61, 23  ;;  %v1327_v54 = vand.u32 8388607, %v5673_v24 }
 0x12c   :  { %v1113_v33 = vsel %vm5690_vm14, nan, %v1112_v19  ;;  %vm1331_vm8 = vcmp.gt.s32.totalorder %v1330_v59, 0  ;;  %v1426_v42 = vand.u32 2139095040, %v4852_v44  ;;  %v4888_v25 = vshrl.u32 %v1278_v41, 30 }
 0x12d   :  { %1742 = vst.msk [vmem:[%s5610_s1 + $0x48] sm:$0xff] %vm1732_vm13, %v1113_v33  ;;  %v1193_v39 = vor.u32 4788187, %v1192_v60  ;;  %v1196_v15 = vcvt.s32.f32 %v1189_v29  ;;  %v1332_v20 = vsel %vm1331_vm8, %v1330_v59, 0  ;;  %v4892_v46 = vsel %vm4871_vm15, 0, %v1201_v32 }
 0x12e   :  { %5758 = vst [vmem:[#allocation26_spill] sm:$0xff] %v4892_v46  ;;  %v1334_v21 = vand.u32 31, %v1332_v20  ;;  %v4895_v18 = vadd.s32 112, %v3723_v1  ;;  %v4898_v55 = vand.u32 3, %v4892_v46  ;;  %v1280_v49 = vshll.u32 %v4888_v25, 30 }
 0x12f   :  { %v1194_v61 = vand.u32 2147483647, %v1193_v39  ;;  %v1273_v29 = vadd.s32 %v4812_v57, %v4837_v37  ;;  %v1328_v59 = vor.u32 8388608, %v1327_v54  ;;  %v1427_v41 = vshrl.u32 %v1426_v42, 23 }
 0x130   :  { %v1335_v60 = vsub.s32 32, %v1334_v21  ;;  %v4904_v33 = vsub.s32 %v1277_v40, %v1280_v49  ;;  %v1337_v10 = vshll.u32 %v5739_v0, %v1334_v21  ;;  %v1340_v39 = vshll.u32 %v5746_v2, %v1334_v21 }
 0x131   :  { %v1197_v32 = vmul.f32 %v1196_v15, %v1194_v61  ;;  %v1343_v30 = vshll.u32 %v5737_v51, %v1334_v21  ;;  %v1346_v19 = vshll.u32 %v5738_v28, %v1334_v21  ;;  %v1333_v37 = vshrl.u32 %v1332_v20, 5 }
 0x132   :  { %v1338_v48 = vshrl.u32 %v5746_v2, %v1335_v60  ;;  %v1341_v24 = vshrl.u32 %v5737_v51, %v1335_v60  ;;  %v1283_v57 = vsub.s32 0, %v4904_v33  ;;  %v1344_v54 = vshrl.u32 %v5738_v28, %v1335_v60 }
 0x133   :  { %v1198_v46 = vxor.u32 2147483648, %v1197_v32  ;;  %v1336_v40 = vshrl.u32 %v5739_v0, %v1335_v60  ;;  %v1347_v42 = vshrl.u32 %v5727_v31, %v1335_v60  ;;  %v4916_v15 = vshll.u32 %v1328_v59, 8 }
 0x134   :  { %v3490_v61 = vadd.s32 4294967169, %v1427_v41  ;;  %v3483_v47 = vmin.u32 %v1283_v57, %v4904_v33  ;;  %v1339_v3 = vor.u32 %v1338_v48, %v1337_v10  ;;  %v1349_v9 = vshll.u32 %v5727_v31, %v1334_v21 }
 0x135   :  { %v1199_v49 = vsel %vm1116_vm0, %v1198_v46, %v1197_v32  ;;  %v1342_v63 = vor.u32 %v1341_v24, %v1340_v39  ;;  %v1345_v62 = vor.u32 %v1344_v54, %v1343_v30  ;;  %v1348_v34 = vor.u32 %v1347_v42, %v1346_v19 }
 0x136   :  { %v1202_v20 = vsel %vm4871_vm15, %v4625_v5, %v1199_v49  ;;  %v1285_v27 = vclz %v3483_v47  ;;  %v1350_v59 = vshrl.u32 %v5728_v23, %v1335_v60  ;;  %vm1352_vm1 = vcmp.lt.s32.totalorder %v1333_v37, 1 }
 0x137   :  { %3676 = vcosq.f32 %v1202_v20  ;;  %vm1353_vm11 = vcmp.lt.s32.totalorder %v1333_v37, 2  ;;  %vm1354_vm0 = vcmp.lt.s32.totalorder %v1333_v37, 3  ;;  %vm1355_vm7 = vcmp.lt.s32.totalorder %v1333_v37, 4 }
 0x138   :  { %3678 = vsinq.f32 %v1202_v20  ;;  %v3484_v46 = vadd.s32 4294967294, %v1285_v27  ;;  %v1351_v10 = vor.u32 %v1350_v59, %v1349_v9  ;;  %v1356_v48 = vsel %vm1352_vm1, %v1336_v40, %v1339_v3 }
 0x139   :  { %v1357_v21 = vsel %vm1355_vm7, %v1345_v62, 2102212464  ;;  %v1360_v50 = vsel %vm1352_vm1, %v1339_v3, %v1342_v63  ;;  %v1361_v32 = vsel %vm1355_vm7, %v1348_v34, 920167782  ;;  %v1364_v24 = vsel %vm1352_vm1, %v1342_v63, %v1345_v62 }
 0x13a   :  { %v1358_v41 = vsel %vm1354_vm0, %v1342_v63, %v1357_v21  ;;  %vm3485_vm5 = vcmp.lt.s32.totalorder %v3484_v46, 0  ;;  %v1362_v30 = vsel %vm1354_vm0, %v1345_v62, %v1361_v32  ;;  %v1365_v47 = vsel %vm1355_vm7, %v1351_v10, 1326507024 }
 0x13b   :  { %v1433_v19 = vadd.s32 1, %v3490_v61  ;;  %vm5689_vm15 = vweird.f32 %v4625_v5  ;;  %v1288_v60 = vsel %vm3485_vm5, 0, %v3484_v46  ;;  %v1359_v39 = vsel %vm1353_vm11, %v1356_v48, %v1358_v41 }
 0x13c   :  { %v1363_v27 = vsel %vm1353_vm11, %v1360_v50, %v1362_v30  ;;  %v1366_v9 = vsel %vm1354_vm0, %v1348_v34, %v1365_v47  ;;  %v1289_v57 = vsub.s32 32, %v1288_v60  ;;  %v1290_v54 = vshll.u32 %v4904_v33, %v1288_v60 }
 0x13d   :  { %v1293_v3 = vsub.s32 4294967266, %v1288_v60  ;;  %v1367_v63 = vsel %vm1353_vm11, %v1364_v24, %v1366_v9  ;;  %v4939_v42 = vmul.u32.u64.low %v4916_v15, %v1363_v27  ;;  %v4940_v61 = vmul.u32.u64.high %v4916_v15, %v1363_v27, %v4939_v42 }
 0x13e   :  { %v4935_v40 = vmul.u32.u64.low %v4916_v15, %v1367_v63  ;;  %v4936_v62 = vmul.u32.u64.high %v4916_v15, %v1367_v63, %v4935_v40  ;;  %vm1208_vm8 = vcmp.lt.s32.totalorder %v4898_v55, 2  ;;  %v1291_v49 = vshrl.u32 %v1273_v29, %v1289_v57 }
 0x13f   :  { %v1294_v20 = vadd.s32 127, %v1293_v3  ;;  %vm1434_vm1 = vcmp.gt.s32.totalorder %v1433_v19, 0  ;;  %vm1209_vm0 = vcmp.eq.s32.totalorder %v4898_v55, 0  ;;  %vm1212_vm7 = vcmp.eq.s32.totalorder %v4898_v55, 2 }
 0x140   :  { %vm1219_vm11 = vcmp.lt.s32.totalorder %v4653_v56, 0  ;;  %v1435_v34 = vsel %vm1434_vm1, %v1433_v19, 0  ;;  %v59_v33 = vcvt.s32.f32 %v4895_v18  ;;  %v5759_v59 = vand.u32 2147483647, %v4653_v56 }
 0x141   :  { %v4948_v37 = vpop.eup %3676  ;;  %v1292_v29 = vor.u32 %v1291_v49, %v1290_v54  ;;  %v1295_v10 = vshll.u32 %v1294_v20, 23  ;;  %v1375_v48 = vmul.u32 %v4916_v15, %v1359_v39  ;;  %v1437_v21 = vand.u32 31, %v1435_v34 }
 0x142   :  { %vm4952_vm5 = vcmp.le.f32.partialorder %v5759_v59, 0.7853982  ;;  %v4957_v41 = vpop.eup %3678  ;;  %v5687_v50 = vxor.u32 2147483648, %v4948_v37  ;;  %vm1377_vm1 = vc.u32 %v4936_v62, %v4939_v42  ;;  %v1378_v18 = vadd.s32 1, %v4940_v61 }
 0x143   :  { %v5762_v32 = vand.u32 2147483647, %v4852_v44  ;;  %v5688_v30 = vxor.u32 2147483648, %v4957_v41  ;;  %v1296_v47 = vor.u32 4788187, %v1295_v10  ;;  %v1299_v19 = vcvt.s32.f32 %v1292_v29 }
 0x144   :  { %v1438_v60 = vsub.s32 32, %v1437_v21  ;;  %v1214_v15 = vsel %vm1212_vm7, %v5687_v50, %v4957_v41  ;;  %v1303_v39 = vsub.s32 4, %v4888_v25  ;;  %v1379_v27 = vsel %vm1377_vm1, %v1378_v18, %v4940_v61 }
 0x145   :  { %v1430_v24 = vand.u32 8388607, %v5762_v32  ;;  %v1440_v9 = vshll.u32 %v5739_v0, %v1437_v21  ;;  %v1211_v57 = vsel %vm1209_vm0, %v4948_v37, %v5688_v30  ;;  %v1297_v54 = vand.u32 2147483647, %v1296_v47 }
 0x146   :  { %v1380_v3 = vadd.s32 %v1379_v27, %v1375_v48  ;;  %v1443_v63 = vshll.u32 %v5746_v2, %v1437_v21  ;;  %v1215_v40 = vsel %vm1208_vm8, %v1211_v57, %v1214_v15  ;;  %v1441_v49 = vshrl.u32 %v5746_v2, %v1438_v60 }
 0x147   :  { %v1444_v20 = vshrl.u32 %v5737_v51, %v1438_v60  ;;  %v1446_v61 = vshll.u32 %v5737_v51, %v1437_v21  ;;  %v1216_v59 = vsel %vm5689_vm15, nan, %v1215_v40  ;;  %v1300_v29 = vmul.f32 %v1299_v19, %v1297_v54 }
 0x148   :  { %v1381_v10 = vadd.s32 536870912, %v1380_v3  ;;  %v1447_v18 = vshrl.u32 %v5738_v28, %v1438_v60  ;;  %1743 = vst.msk [vmem:[%s5610_s1 + $0x50] sm:$0xff] %vm1732_vm13, %v1216_v59  ;;  %v1431_v55 = vor.u32 8388608, %v1430_v24  ;;  %v1436_v48 = vshrl.u32 %v1435_v34, 5 }
 0x149   :  { %v1449_v32 = vshll.u32 %v5738_v28, %v1437_v21  ;;  %v1450_v47 = vshrl.u32 %v5727_v31, %v1438_v60  ;;  %v1301_v15 = vxor.u32 2147483648, %v1300_v29  ;;  %v1452_v57 = vshll.u32 %v5727_v31, %v1437_v21 }
 0x14a   :  { %v4994_v27 = vshrl.u32 %v1381_v10, 30  ;;  %v4998_v19 = vmul.f32 %v4828_v8, %v59_v33  ;;  %v1304_v54 = vsel %vm1219_vm11, %v1303_v39, %v4888_v25  ;;  %v1442_v40 = vor.u32 %v1441_v49, %v1440_v9 }
 0x14b   :  { %v1445_v59 = vor.u32 %v1444_v20, %v1443_v63  ;;  %v1453_v34 = vshrl.u32 %v5728_v23, %v1438_v60  ;;  %v1302_v24 = vsel %vm1219_vm11, %v1301_v15, %v1300_v29  ;;  %v1448_v10 = vor.u32 %v1447_v18, %v1446_v61 }
 0x14c   :  { %v1383_v50 = vshll.u32 %v4994_v27, 30  ;;  %v1451_v30 = vor.u32 %v1450_v47, %v1449_v32  ;;  %v1305_v33 = vsel %vm4952_vm5, %v4653_v56, %v1302_v24  ;;  %vm1455_vm8 = vcmp.lt.s32.totalorder %v1436_v48, 1 }
 0x14d   :  { %v1454_v21 = vor.u32 %v1453_v34, %v1452_v57  ;;  %vm1458_vm0 = vcmp.lt.s32.totalorder %v1436_v48, 4  ;;  %3680 = vcosq.f32 %v1305_v33  ;;  %v1439_v39 = vshrl.u32 %v5739_v0, %v1438_v60 }
 0x14e   :  { %v5010_v25 = vsub.s32 %v1380_v3, %v1383_v50  ;;  %vm1457_vm7 = vcmp.lt.s32.totalorder %v1436_v48, 3  ;;  %3682 = vsinq.f32 %v1305_v33  ;;  %v1460_v9 = vsel %vm1458_vm0, %v1448_v10, 2102212464 }
 0x14f   :  { %v1471_v63 = vshll.u32 %v1431_v55, 8  ;;  %v1529_v49 = vand.u32 2139095040, %v4998_v19  ;;  %vm1456_vm11 = vcmp.lt.s32.totalorder %v1436_v48, 2  ;;  %v1463_v61 = vsel %vm1455_vm8, %v1442_v40, %v1445_v59 }
 0x150   :  { %v1386_v20 = vsub.s32 0, %v5010_v25  ;;  %v1464_v29 = vsel %vm1458_vm0, %v1451_v30, 920167782  ;;  %v5020_v50 = vsel %vm4952_vm5, 0, %v1304_v54  ;;  %v1467_v3 = vsel %vm1455_vm8, %v1445_v59, %v1448_v10 }
 0x151   :  { %v1465_v60 = vsel %vm1457_vm7, %v1448_v10, %v1464_v29  ;;  %v1468_v18 = vsel %vm1458_vm0, %v1454_v21, 1326507024  ;;  %v1310_v55 = vand.u32 3, %v5020_v50  ;;  %v1459_v47 = vsel %vm1455_vm8, %v1439_v39, %v1442_v40 }
 0x152   :  { %v3487_v32 = vmin.u32 %v1386_v20, %v5010_v25  ;;  %v1461_v15 = vsel %vm1457_vm7, %v1445_v59, %v1460_v9  ;;  %vm5698_vm1 = vweird.f32 %v4653_v56  ;;  %v1466_v46 = vsel %vm1456_vm11, %v1463_v61, %v1465_v60 }
 0x153   :  { %v1469_v57 = vsel %vm1457_vm7, %v1451_v30, %v1468_v18  ;;  %v1530_v54 = vshrl.u32 %v1529_v49, 23  ;;  %v27_v34 = vadd.s32 120, %v3723_v1  ;;  %v1462_v40 = vsel %vm1456_vm11, %v1459_v47, %v1461_v15 }
 0x154   :  { %v1388_v24 = vclz %v3487_v32  ;;  %v1470_v10 = vsel %vm1456_vm11, %v1467_v3, %v1469_v57  ;;  %v5034_v33 = vmul.u32.u64.low %v1471_v63, %v1466_v46  ;;  %v5035_v21 = vmul.u32.u64.high %v1471_v63, %v1466_v46, %v5034_v33 }
 0x155   :  { %v5039_v39 = vmul.u32.u64.low %v1471_v63, %v1470_v10  ;;  %v5040_v59 = vmul.u32.u64.high %v1471_v63, %v1470_v10, %v5039_v39  ;;  %v3494_v9 = vadd.s32 4294967169, %v1530_v54  ;;  %vm1311_vm5 = vcmp.lt.s32.totalorder %v1310_v55, 2 }
 0x156   :  { %v5763_v20 = vand.u32 2147483647, %v4831_v16  ;;  %vm1322_vm0 = vcmp.lt.s32.totalorder %v4831_v16, 0  ;;  %v3488_v1 = vadd.s32 4294967294, %v1388_v24  ;;  %vm1312_vm7 = vcmp.eq.s32.totalorder %v1310_v55, 0 }
 0x157   :  { %vm1315_vm15 = vcmp.eq.s32.totalorder %v1310_v55, 2  ;;  %v1406_v49 = vsub.s32 4, %v4994_v27  ;;  %v1536_v48 = vadd.s32 1, %v3494_v9  ;;  %v5050_v61 = vpop.eup %3680  ;;  %v1376_v29 = vadd.s32 %v4939_v42, %v4936_v62 }
 0x158   :  { %vm5044_vm8 = vcmp.le.f32.partialorder %v5763_v20, 0.7853982  ;;  %5766 = vst [vmem:[#allocation27_spill] sm:$0xff] %v5050_v61  ;;  %vm3489_vm11 = vcmp.lt.s32.totalorder %v3488_v1, 0  ;;  %v1478_v60 = vmul.u32 %v1471_v63, %v1462_v40  ;;  %v1481_v3 = vadd.s32 1, %v5035_v21  ;;  %v5055_v18 = vpop.eup %3682 }
 0x159   :  { %v5691_v32 = vxor.u32 2147483648, %v5050_v61  ;;  %v1391_v47 = vsel %vm3489_vm11, 0, %v3488_v1  ;;  %vm1480_vm14 = vc.u32 %v5040_v59, %v5034_v33  ;;  %v5693_v15 = vand.u32 2147483647, %v4998_v19 }
 0x15a   :  { %v5692_v46 = vxor.u32 2147483648, %v5055_v18  ;;  %v1392_v57 = vsub.s32 32, %v1391_v47  ;;  %v1393_v54 = vshll.u32 %v5010_v25, %v1391_v47  ;;  %v1396_v62 = vsub.s32 4294967266, %v1391_v47 }
 0x15b   :  { %v1317_v42 = vsel %vm1315_vm15, %v5691_v32, %v5055_v18  ;;  %v1407_v63 = vsel %vm1322_vm0, %v1406_v49, %v4994_v27  ;;  %v1482_v24 = vsel %vm1480_vm14, %v1481_v3, %v5035_v21  ;;  %vm1537_vm11 = vcmp.gt.s32.totalorder %v1536_v48, 0 }
 0x15c   :  { %v1314_v10 = vsel %vm1312_vm7, %v5050_v61, %v5692_v46  ;;  %v1394_v40 = vshrl.u32 %v1376_v29, %v1392_v57  ;;  %v1397_v25 = vadd.s32 127, %v1396_v62  ;;  %v1483_v39 = vadd.s32 %v1482_v24, %v1478_v60 }
 0x15d   :  { %v1318_v9 = vsel %vm1311_vm5, %v1314_v10, %v1317_v42  ;;  %v1533_v20 = vand.u32 8388607, %v5693_v15  ;;  %v1538_v1 = vsel %vm1537_vm11, %v1536_v48, 0  ;;  %v60_v47 = vcvt.s32.f32 %v27_v34 }
 0x15e   :  { %v1319_v27 = vsel %vm5698_vm1, nan, %v1318_v9  ;;  %v1395_v21 = vor.u32 %v1394_v40, %v1393_v54  ;;  %v1398_v49 = vshll.u32 %v1397_v25, 23  ;;  %v1484_v3 = vadd.s32 536870912, %v1483_v39 }
 0x15f   :  { %1744 = vst.msk [vmem:[%s5610_s1 + $0x58] sm:$0xff] %vm1732_vm13, %v1319_v27  ;;  %v5086_v55 = vsel %vm5044_vm8, 0, %v1407_v63  ;;  %v1540_v29 = vand.u32 31, %v1538_v1  ;;  %v1534_v54 = vor.u32 8388608, %v1533_v20  ;;  %v5093_v62 = vshrl.u32 %v1538_v1, 5 }
 0x160   :  { %v1399_v60 = vor.u32 4788187, %v1398_v49  ;;  %v1402_v57 = vcvt.s32.f32 %v1395_v21  ;;  %v5089_v34 = vand.u32 3, %v5086_v55  ;;  %v5091_v48 = vshrl.u32 %v1484_v3, 30 }
 0x161   :  { %v1541_v42 = vsub.s32 32, %v1540_v29  ;;  %v5096_v24 = vmul.f32 %v4828_v8, %v60_v47  ;;  %v1543_v63 = vshll.u32 %v5739_v0, %v1540_v29  ;;  %v1546_v25 = vshll.u32 %v5746_v2, %v1540_v29 }
 0x162   :  { %v1400_v10 = vand.u32 2147483647, %v1399_v60  ;;  %v1486_v40 = vshll.u32 %v5091_v48, 30  ;;  %v1549_v21 = vshll.u32 %v5737_v51, %v1540_v29  ;;  %v1552_v20 = vshll.u32 %v5738_v28, %v1540_v29 }
 0x163   :  { %v1544_v9 = vshrl.u32 %v5746_v2, %v1541_v42  ;;  %v1547_v27 = vshrl.u32 %v5737_v51, %v1541_v42  ;;  %v1550_v8 = vshrl.u32 %v5738_v28, %v1541_v42  ;;  %v1553_v47 = vshrl.u32 %v5727_v31, %v1541_v42 }
 0x164   :  { %v1403_v1 = vmul.f32 %v1402_v57, %v1400_v10  ;;  %v5105_v49 = vsub.s32 %v1483_v39, %v1486_v40  ;;  %v1479_v3 = vadd.s32 %v5034_v33, %v5040_v59  ;;  %v5111_v60 = vshll.u32 %v1534_v54, 8 }
 0x165   :  { %v1632_v46 = vand.u32 2139095040, %v5096_v24  ;;  %v1542_v57 = vshrl.u32 %v5739_v0, %v1541_v42  ;;  %v1545_v39 = vor.u32 %v1544_v9, %v1543_v63  ;;  %v1548_v10 = vor.u32 %v1547_v27, %v1546_v25 }
 0x166   :  { %v1404_v15 = vxor.u32 2147483648, %v1403_v1  ;;  %v1489_v56 = vsub.s32 0, %v5105_v49  ;;  %v1554_v40 = vor.u32 %v1553_v47, %v1552_v20  ;;  %v1555_v5 = vshll.u32 %v5727_v31, %v1540_v29 }
 0x167   :  { %v1556_v61 = vshrl.u32 %v5728_v23, %v1541_v42  ;;  %v1551_v54 = vor.u32 %v1550_v8, %v1549_v21  ;;  %vm1558_vm14 = vcmp.lt.s32.totalorder %v5093_v62, 1  ;;  %vm1425_vm15 = vcmp.lt.s32.totalorder %v4852_v44, 0 }
 0x168   :  { %v1405_v33 = vsel %vm1322_vm0, %v1404_v15, %v1403_v1  ;;  %v3491_v59 = vmin.u32 %v1489_v56, %v5105_v49  ;;  %v1509_v63 = vsub.s32 4, %v5091_v48  ;;  %vm1560_vm5 = vcmp.lt.s32.totalorder %v5093_v62, 3 }
 0x169   :  { %v1408_v32 = vsel %vm5044_vm8, %v4831_v16, %v1405_v33  ;;  %v1557_v25 = vor.u32 %v1556_v61, %v1555_v5  ;;  %vm1559_vm0 = vcmp.lt.s32.totalorder %v5093_v62, 2  ;;  %vm1561_vm7 = vcmp.lt.s32.totalorder %v5093_v62, 4 }
 0x16a   :  { %3684 = vcosq.f32 %v1408_v32  ;;  %v1491_v29 = vclz %v3491_v59  ;;  %v1563_v56 = vsel %vm1561_vm7, %v1551_v54, 2102212464  ;;  %v1566_v15 = vsel %vm1558_vm14, %v1545_v39, %v1548_v10 }
 0x16b   :  { %3686 = vsinq.f32 %v1408_v32  ;;  %v1567_v30 = vsel %vm1561_vm7, %v1554_v40, 920167782  ;;  %vm1418_vm8 = vcmp.eq.s32.totalorder %v5089_v34, 2  ;;  %v5767_v42 = vand.u32 2147483647, %v4852_v44 }
 0x16c   :  { %v3492_v61 = vadd.s32 4294967294, %v1491_v29  ;;  %v1562_v9 = vsel %vm1558_vm14, %v1542_v57, %v1545_v39  ;;  %v1568_v32 = vsel %vm1560_vm5, %v1551_v54, %v1567_v30  ;;  %v1570_v27 = vsel %vm1558_vm14, %v1548_v10, %v1551_v54 }
 0x16d   :  { %vm5136_vm11 = vcmp.le.f32.partialorder %v5767_v42, 0.7853982  ;;  %vm1415_vm1 = vcmp.eq.s32.totalorder %v5089_v34, 0  ;;  %v1564_v21 = vsel %vm1560_vm5, %v1548_v10, %v1563_v56  ;;  %v1569_v20 = vsel %vm1559_vm0, %v1566_v15, %v1568_v32 }
 0x16e   :  { %v1571_v1 = vsel %vm1561_vm7, %v1557_v25, 1326507024  ;;  %v1633_v8 = vshrl.u32 %v1632_v46, 23  ;;  %vm1414_vm10 = vcmp.lt.s32.totalorder %v5089_v34, 2  ;;  %vm3493_vm9 = vcmp.lt.s32.totalorder %v3492_v61, 0 }
 0x16f   :  { %v1572_v47 = vsel %vm1560_vm5, %v1554_v40, %v1571_v1  ;;  %v5155_v57 = vmul.u32.u64.low %v5111_v60, %v1569_v20  ;;  %v5156_v39 = vmul.u32.u64.high %v5111_v60, %v1569_v20, %v5155_v57  ;;  %vm5702_vm14 = vweird.f32 %v4831_v16 }
 0x170   :  { %v1494_v33 = vsel %vm3493_vm9, 0, %v3492_v61  ;;  %v1573_v10 = vsel %vm1559_vm0, %v1570_v27, %v1572_v47  ;;  %v3498_v59 = vadd.s32 4294967169, %v1633_v8  ;;  %v5770_v46 = vand.u32 2147483647, %v5096_v24 }
 0x171   :  { %v1495_v25 = vsub.s32 32, %v1494_v33  ;;  %v1496_v29 = vshll.u32 %v5105_v49, %v1494_v33  ;;  %v1499_v56 = vsub.s32 4294967266, %v1494_v33  ;;  %v1565_v40 = vsel %vm1559_vm0, %v1562_v9, %v1564_v21 }
 0x172   :  { %v1636_v54 = vand.u32 8388607, %v5770_v46  ;;  %v5168_v15 = vmul.u32.u64.low %v5111_v60, %v1573_v10  ;;  %v5169_v30 = vmul.u32.u64.high %v5111_v60, %v1573_v10, %v5168_v15  ;;  %v1639_v42 = vadd.s32 1, %v3498_v59 }
 0x173   :  { %v1842_v61 = vadd.s32 3, %v3943_v58  ;;  %v1497_v32 = vshrl.u32 %v1479_v3, %v1495_v25  ;;  %v1500_v27 = vadd.s32 127, %v1499_v56  ;;  %v1510_v20 = vsel %vm1425_vm15, %v1509_v63, %v5091_v48 }
 0x174   :  { %v1584_v1 = vadd.s32 1, %v5156_v39  ;;  %v1581_v49 = vmul.u32 %v5111_v60, %v1565_v40  ;;  %vm1640_vm9 = vcmp.gt.s32.totalorder %v1639_v42, 0  ;;  %v5178_v62 = vadd.s32 3, %v3953_v38  ;;  %v5183_v21 = vpop.eup %3684 }
 0x175   :  { %v5181_v9 = vadd.s32 3, %v4096_v45  ;;  %v1498_v58 = vor.u32 %v1497_v32, %v1496_v29  ;;  %v1501_v3 = vshll.u32 %v1500_v27, 23  ;;  %v1637_v8 = vor.u32 8388608, %v1636_v54  ;;  %v5185_v33 = vpop.eup %3686 }
 0x176   :  { %v1641_v47 = vsel %vm1640_vm9, %v1639_v42, 0  ;;  %v5701_v48 = vxor.u32 2147483648, %v5183_v21  ;;  %v5190_v60 = vsel %vm5136_vm11, 0, %v1510_v20  ;;  %vm1583_vm5 = vc.u32 %v5169_v30, %v5155_v57 }
 0x177   :  { %v5194_v38 = vand.u32 3, %v1842_v61  ;;  %v1416_v45 = vxor.u32 2147483648, %v5185_v33  ;;  %v1502_v63 = vor.u32 4788187, %v1501_v3  ;;  %v1505_v10 = vcvt.s32.f32 %v1498_v58 }
 0x178   :  { %v1585_v59 = vsel %vm1583_vm5, %v1584_v1, %v5156_v39  ;;  %v1420_v46 = vsel %vm1418_vm8, %v5701_v48, %v5185_v33  ;;  %v5204_v54 = vand.u32 3, %v5190_v60  ;;  %v1643_v29 = vand.u32 31, %v1641_v47 }
 0x179   :  { %v1586_v25 = vadd.s32 %v1585_v59, %v1581_v49  ;;  %v1417_v56 = vsel %vm1415_vm1, %v5183_v21, %v1416_v45  ;;  %v1503_v40 = vand.u32 2147483647, %v1502_v63  ;;  %v5211_v15 = vshrl.u32 %v1641_v47, 5 }
 0x17a   :  { %v5213_v39 = vshll.u32 %v1637_v8, 8  ;;  %v1421_v42 = vsel %vm1414_vm10, %v1417_v56, %v1420_v46  ;;  %v1644_v32 = vsub.s32 32, %v1643_v29  ;;  %v1646_v27 = vshll.u32 %v5739_v0, %v1643_v29 }
 0x17b   :  { %v1587_v61 = vadd.s32 536870912, %v1586_v25  ;;  %v1422_v20 = vsel %vm5702_vm14, nan, %v1421_v42  ;;  %v1506_v1 = vmul.f32 %v1505_v10, %v1503_v40  ;;  %v1649_v49 = vshll.u32 %v5746_v2, %v1643_v29 }
 0x17c   :  { %vm1845_vm1 = vcmp.eq.s32.totalorder %v5194_v38, 0  ;;  %1745 = vst.msk [vmem:[%s5610_s1 + $0x60] sm:$0xff] %vm1732_vm13, %v1422_v20  ;;  %v1647_v34 = vshrl.u32 %v5746_v2, %v1644_v32  ;;  %v1650_v3 = vshrl.u32 %v5737_v51, %v1644_v32  ;;  %v1652_v8 = vshll.u32 %v5737_v51, %v1643_v29 }
 0x17d   :  { %v1588_v58 = vshrl.u32 %v1587_v61, 30  ;;  %v1507_v47 = vxor.u32 2147483648, %v1506_v1  ;;  %v1653_v63 = vshrl.u32 %v5738_v28, %v1644_v32  ;;  %v1655_v10 = vshll.u32 %v5738_v28, %v1643_v29 }
 0x17e   :  { %v1656_v59 = vshrl.u32 %v5727_v31, %v1644_v32  ;;  %vm1844_vm10 = vcmp.lt.s32.totalorder %v5194_v38, 2  ;;  %v1645_v56 = vshrl.u32 %v5739_v0, %v1644_v32  ;;  %v1648_v40 = vor.u32 %v1647_v34, %v1646_v27 }
 0x17f   :  { %v1589_v46 = vshll.u32 %v1588_v58, 30  ;;  %vm1661_vm0 = vcmp.lt.s32.totalorder %v5211_v15, 1  ;;  %v1508_v2 = vsel %vm1425_vm15, %v1507_v47, %v1506_v1  ;;  %v1651_v42 = vor.u32 %v1650_v3, %v1649_v49 }
 0x180   :  { %v1657_v51 = vor.u32 %v1656_v59, %v1655_v10  ;;  %v1658_v61 = vshll.u32 %v5727_v31, %v1643_v29  ;;  %v1511_v28 = vsel %vm5136_vm11, %v4852_v44, %v1508_v2  ;;  %vm1528_vm7 = vcmp.lt.s32.totalorder %v4998_v19, 0 }
 0x181   :  { %v5242_v20 = vsub.s32 %v1586_v25, %v1589_v46  ;;  %v1654_v48 = vor.u32 %v1653_v63, %v1652_v8  ;;  %v1659_v0 = vshrl.u32 %v5728_v23, %v1644_v32  ;;  %3688 = vcosq.f32 %v1511_v28 }
 0x182   :  { %vm1664_vm8 = vcmp.lt.s32.totalorder %v5211_v15, 4  ;;  %v5771_v27 = vxor.u32 2147483648, %v4001_v53  ;;  %vm1848_vm15 = vcmp.eq.s32.totalorder %v5194_v38, 2  ;;  %3690 = vsinq.f32 %v1511_v28 }
 0x183   :  { %v1592_v5 = vsub.s32 0, %v5242_v20  ;;  %v1660_v29 = vor.u32 %v1659_v0, %v1658_v61  ;;  %vm1663_vm11 = vcmp.lt.s32.totalorder %v5211_v15, 3  ;;  %vm1662_vm9 = vcmp.lt.s32.totalorder %v5211_v15, 2 }
 0x184   :  { %v1847_v31 = vsel %vm1845_vm1, %v3993_v22, %v5771_v27  ;;  %v1666_v23 = vsel %vm1664_vm8, %v1654_v48, 2102212464  ;;  %v1669_v25 = vsel %vm1661_vm0, %v1648_v40, %v1651_v42  ;;  %v1670_v32 = vsel %vm1664_vm8, %v1657_v51, 920167782 }
 0x185   :  { %vm1518_vm5 = vcmp.eq.s32.totalorder %v5204_v54, 0  ;;  %v3495_v1 = vmin.u32 %v1592_v5, %v5242_v20  ;;  %v1612_v49 = vsub.s32 4, %v1588_v58  ;;  %v1665_v34 = vsel %vm1661_vm0, %v1645_v56, %v1648_v40 }
 0x186   :  { %v1673_v3 = vsel %vm1661_vm0, %v1651_v42, %v1654_v48  ;;  %vm1517_vm1 = vcmp.lt.s32.totalorder %v5204_v54, 2  ;;  %v1667_v8 = vsel %vm1663_vm11, %v1651_v42, %v1666_v23  ;;  %v1671_v47 = vsel %vm1663_vm11, %v1654_v48, %v1670_v32 }
 0x187   :  { %v1674_v63 = vsel %vm1664_vm8, %v1660_v29, 1326507024  ;;  %v5772_v10 = vxor.u32 2147483648, %v3993_v22  ;;  %vm1515_vm14 = vweird.f32 %v4852_v44  ;;  %vm1521_vm0 = vcmp.eq.s32.totalorder %v5204_v54, 2 }
 0x188   :  { %v1594_v46 = vclz %v3495_v1  ;;  %v1672_v56 = vsel %vm1662_vm9, %v1669_v25, %v1671_v47  ;;  %v1675_v48 = vsel %vm1663_vm11, %v1657_v51, %v1674_v63  ;;  %v1668_v40 = vsel %vm1662_vm9, %v1665_v34, %v1667_v8 }
 0x189   :  { %v1850_v59 = vsel %vm1848_vm15, %v5772_v10, %v4001_v53  ;;  %v1676_v22 = vsel %vm1662_vm9, %v1673_v3, %v1675_v48  ;;  %v5290_v2 = vmul.u32.u64.low %v5213_v39, %v1672_v56  ;;  %v5291_v53 = vmul.u32.u64.high %v5213_v39, %v1672_v56, %v5290_v2 }
 0x18a   :  { %v3496_v42 = vadd.s32 4294967294, %v1594_v46  ;;  %v5295_v61 = vmul.u32.u64.low %v5213_v39, %v1676_v22  ;;  %v5296_v28 = vmul.u32.u64.high %v5213_v39, %v1676_v22, %v5295_v61  ;;  %v1851_v0 = vsel %vm1844_vm10, %v1847_v31, %v1850_v59 }
 0x18b   :  { %v1582_v51 = vadd.s32 %v5155_v57, %v5169_v30  ;;  %v1613_v15 = vsel %vm1528_vm7, %v1612_v49, %v1588_v58  ;;  %v1852_v27 = vsel %vm176_vm12, nan, %v1851_v0  ;;  %v1947_v5 = vand.u32 3, %v5178_v62  ;;  %v5320_v30 = vpop.eup %3688 }
 0x18c   :  { %v5773_v29 = vand.u32 2147483647, %v4998_v19  ;;  %vm3497_vm15 = vcmp.lt.s32.totalorder %v3496_v42, 0  ;;  %v1684_v38 = vmul.u32 %v5213_v39, %v1668_v40  ;;  %3413 = vst.msk [vmem:[%s5611_s2] sm:$0xff] %vm1732_vm13, %v1852_v27  ;;  %v2051_v57 = vand.u32 3, %v5181_v9  ;;  %v5324_v25 = vpop.eup %3690 }
 0x18d   :  { %v1597_v62 = vsel %vm3497_vm15, 0, %v3496_v42  ;;  %v1687_v58 = vadd.s32 1, %v5291_v53  ;;  %vm1949_vm12 = vcmp.eq.s32.totalorder %v1947_v5, 0  ;;  %v2258_v31 = vadd.s32 3, %v4272_v43 }
 0x18e   :  { %vm5309_vm8 = vcmp.le.f32.partialorder %v5773_v29, 0.7853982  ;;  %v1522_v39 = vxor.u32 2147483648, %v5320_v30  ;;  %v1598_v32 = vsub.s32 32, %v1597_v62  ;;  %v1599_v1 = vshll.u32 %v5242_v20, %v1597_v62 }
 0x18f   :  { %v1602_v49 = vsub.s32 4294967266, %v1597_v62  ;;  %v1519_v9 = vxor.u32 2147483648, %v5324_v25  ;;  %vm1686_vm10 = vc.u32 %v5296_v28, %v5290_v2  ;;  %vm1948_vm11 = vcmp.lt.s32.totalorder %v1947_v5, 2 }
 0x190   :  { %v5776_v14 = vxor.u32 2147483648, %v4052_v4  ;;  %v1523_v43 = vsel %vm1521_vm0, %v1522_v39, %v5324_v25  ;;  %v1600_v3 = vshrl.u32 %v1582_v51, %v1598_v32  ;;  %v1688_v20 = vsel %vm1686_vm10, %v1687_v58, %v5291_v53 }
 0x191   :  { %v1603_v8 = vadd.s32 127, %v1602_v49  ;;  %v1520_v47 = vsel %vm1518_vm5, %v5320_v30, %v1519_v9  ;;  %v1689_v63 = vadd.s32 %v1688_v20, %v1684_v38  ;;  %vm1952_vm9 = vcmp.eq.s32.totalorder %v1947_v5, 2 }
 0x192   :  { %v1951_v34 = vsel %vm1949_vm12, %v4049_v26, %v5776_v14  ;;  %vm2052_vm15 = vcmp.lt.s32.totalorder %v2051_v57, 2  ;;  %v1524_v10 = vsel %vm1517_vm1, %v1520_v47, %v1523_v43  ;;  %v1601_v59 = vor.u32 %v1600_v3, %v1599_v1 }
 0x193   :  { %v1604_v46 = vshll.u32 %v1603_v8, 23  ;;  %v5777_v56 = vxor.u32 2147483648, %v4049_v26  ;;  %v1525_v40 = vsel %vm1515_vm14, nan, %v1524_v10  ;;  %v1690_v22 = vadd.s32 536870912, %v1689_v63 }
 0x194   :  { %vm2053_vm0 = vcmp.eq.s32.totalorder %v2051_v57, 0  ;;  %1746 = vst.msk [vmem:[%s5610_s1 + $0x68] sm:$0xff] %vm1732_vm13, %v1525_v40  ;;  %v1608_v42 = vcvt.s32.f32 %v1601_v59  ;;  %vm1631_vm5 = vcmp.lt.s32.totalorder %v5096_v24, 0  ;;  %v5365_v0 = vsel %vm5309_vm8, 0, %v1613_v15 }
 0x195   :  { %v1954_v48 = vsel %vm1952_vm9, %v5777_v56, %v4052_v4  ;;  %v1605_v54 = vor.u32 4788187, %v1604_v46  ;;  %v5778_v4 = vxor.u32 2147483648, %v4140_v13  ;;  %v1691_v51 = vshrl.u32 %v1690_v22, 30 }
 0x196   :  { %v1955_v53 = vsel %vm1948_vm11, %v1951_v34, %v1954_v48  ;;  %vm2056_vm1 = vcmp.eq.s32.totalorder %v2051_v57, 2  ;;  %v2155_v27 = vand.u32 3, %v2154_v6  ;;  %v5779_v11 = vxor.u32 2147483648, %v4137_v7 }
 0x197   :  { %v1956_v26 = vsel %vm279_vm3, nan, %v1955_v53  ;;  %v2055_v61 = vsel %vm2053_vm0, %v4137_v7, %v5778_v4  ;;  %v1606_v5 = vand.u32 2147483647, %v1605_v54  ;;  %v2362_v38 = vadd.s32 3, %v4387_v35  ;;  %v5787_v54 = vld [vmem:[#allocation11_spill] sm:$0xff] }
 0x198   :  { %3414 = vst.msk [vmem:[%s5611_s2 + $0x8] sm:$0xff] %vm1732_vm13, %v1956_v26  ;;  %v2058_v29 = vsel %vm2056_vm1, %v5779_v11, %v4140_v13  ;;  %v2466_v62 = vadd.s32 3, %v4512_v36  ;;  %v1692_v58 = vshll.u32 %v1691_v51, 30  ;;  %vm2156_vm3 = vcmp.lt.s32.totalorder %v2155_v27, 2  ;;  %v5789_v26 = vld [vmem:[#allocation10_spill] sm:$0xff] }
 0x199   :  { %v2059_v15 = vsel %vm2052_vm15, %v2055_v61, %v2058_v29  ;;  %v2259_v32 = vand.u32 3, %v2258_v31  ;;  %v1609_v1 = vmul.f32 %v1608_v42, %v1606_v5  ;;  %vm2157_vm12 = vcmp.eq.s32.totalorder %v2155_v27, 0  ;;  %v5792_v5 = vld [vmem:[#allocation14_spill] sm:$0xff]  ;;  %v5794_v29 = vld [vmem:[#allocation13_spill] sm:$0xff] }
 0x19a   :  { %v2060_v49 = vsel %vm382_vm2, nan, %v2059_v15  ;;  %vm2160_vm10 = vcmp.eq.s32.totalorder %v2155_v27, 2  ;;  %v5379_v6 = vsub.s32 %v1689_v63, %v1692_v58  ;;  %v1715_v14 = vsub.s32 4, %v1691_v51  ;;  %v5785_v63 = vld [vmem:[#allocation7_spill] sm:$0xff] }
 0x19b   :  { %3415 = vst.msk [vmem:[%s5611_s2 + $0x10] sm:$0xff] %vm1732_vm13, %v2060_v49  ;;  %v5780_v7 = vxor.u32 2147483648, %v4246_v17  ;;  %v5781_v35 = vxor.u32 2147483648, %v4239_v52  ;;  %v1610_v12 = vxor.u32 2147483648, %v1609_v1  ;;  %v5392_v57 = vand.u32 3, %v5365_v0  ;;  %v5797_v49 = vld [vmem:[#allocation20_spill] sm:$0xff] }
 0x19c   :  { %v2363_v34 = vand.u32 3, %v2362_v38  ;;  %v1695_v43 = vsub.s32 0, %v5379_v6  ;;  %vm2261_vm2 = vcmp.eq.s32.totalorder %v2259_v32, 0  ;;  %v2467_v20 = vand.u32 3, %v2466_v62 }
 0x19d   :  { %v2159_v13 = vsel %vm2157_vm12, %v4239_v52, %v5780_v7  ;;  %v2162_v36 = vsel %vm2160_vm10, %v5781_v35, %v4246_v17  ;;  %v1611_v47 = vsel %vm1528_vm7, %v1610_v12, %v1609_v1  ;;  %vm2260_vm11 = vcmp.lt.s32.totalorder %v2259_v32, 2  ;;  %v5783_v52 = vld [vmem:[#allocation8_spill] sm:$0xff] }
 0x19e   :  { %v2163_v31 = vsel %vm2156_vm3, %v2159_v13, %v2162_v36  ;;  %v5784_v17 = vxor.u32 2147483648, %v5783_v52  ;;  %vm2264_vm9 = vcmp.eq.s32.totalorder %v2259_v32, 2  ;;  %v1614_v59 = vsel %vm5309_vm8, %v4998_v19, %v1611_v47  ;;  %v5796_v32 = vld [vmem:[#allocation15_spill] sm:$0xff]  ;;  %v5798_v7 = vld [vmem:[#allocation4_spill] sm:$0xff] }
 0x19f   :  { %v2164_v8 = vsel %vm485_vm4, nan, %v2163_v31  ;;  %v1685_v46 = vadd.s32 %v5290_v2, %v5296_v28  ;;  %v3499_v56 = vmin.u32 %v1695_v43, %v5379_v6  ;;  %v5414_v48 = vsel %vm1631_vm5, %v1715_v14, %v1691_v51  ;;  %v5800_v36 = vld [vmem:[#allocation23_spill] sm:$0xff] }
 0x1a0   :  { %3416 = vst.msk [vmem:[%s5611_s2 + $0x18] sm:$0xff] %vm1732_vm13, %v2164_v8  ;;  %v2263_v10 = vsel %vm2261_vm2, %v5785_v63, %v5784_v17  ;;  %3692 = vcosq.f32 %v1614_v59  ;;  %v5786_v40 = vxor.u32 2147483648, %v5785_v63  ;;  %vm2364_vm4 = vcmp.lt.s32.totalorder %v2363_v34, 2 }
 0x1a1   :  { %vm2365_vm7 = vcmp.eq.s32.totalorder %v2363_v34, 0  ;;  %3694 = vsinq.f32 %v1614_v59  ;;  %v1697_v53 = vclz %v3499_v56  ;;  %v5788_v42 = vxor.u32 2147483648, %v5787_v54 }
 0x1a2   :  { %v2266_v22 = vsel %vm2264_vm9, %v5786_v40, %v5783_v52  ;;  %vm1624_vm8 = vcmp.eq.s32.totalorder %v5392_v57, 2  ;;  %vm2368_vm15 = vcmp.eq.s32.totalorder %v2363_v34, 2  ;;  %vm2468_vm0 = vcmp.lt.s32.totalorder %v2467_v20, 2  ;;  %v5801_v34 = vld [vmem:[#allocation5_spill] sm:$0xff] }
 0x1a3   :  { %v2267_v23 = vsel %vm2260_vm11, %v2263_v10, %v2266_v22  ;;  %v2367_v2 = vsel %vm2365_vm7, %v5789_v26, %v5788_v42  ;;  %vm2469_vm1 = vcmp.eq.s32.totalorder %v2467_v20, 0  ;;  %vm1621_vm3 = vcmp.eq.s32.totalorder %v5392_v57, 0  ;;  %v5808_v22 = vld [vmem:[#allocation17_spill] sm:$0xff]  ;;  %v5832_v10 = vld [vmem:[#allocation18_spill] sm:$0xff] }
 0x1a4   :  { %v2268_v4 = vsel %vm588_vm6, nan, %v2267_v23  ;;  %v3500_v61 = vadd.s32 4294967294, %v1697_v53  ;;  %v5791_v51 = vxor.u32 2147483648, %v5789_v26  ;;  %v5793_v11 = vxor.u32 2147483648, %v5792_v5 }
 0x1a5   :  { %3417 = vst.msk [vmem:[%s5611_s2 + $0x20] sm:$0xff] %vm1732_vm13, %v2268_v4  ;;  %vm2472_vm6 = vcmp.eq.s32.totalorder %v2467_v20, 2  ;;  %vm1620_vm12 = vcmp.lt.s32.totalorder %v5392_v57, 2  ;;  %v5795_v58 = vxor.u32 2147483648, %v5794_v29  ;;  %v2570_v1 = vadd.s32 3, %v5796_v32 }
 0x1a6   :  { %v2370_v27 = vsel %vm2368_vm15, %v5791_v51, %v5787_v54  ;;  %v2471_v38 = vsel %vm2469_vm1, %v5794_v29, %v5793_v11  ;;  %v2674_v14 = vadd.s32 3, %v5797_v49  ;;  %vm1618_vm10 = vweird.f32 %v4998_v19  ;;  %v5814_v29 = vld [vmem:[#allocation21_spill] sm:$0xff] }
 0x1a7   :  { %v2371_v62 = vsel %vm2364_vm4, %v2367_v2, %v2370_v27  ;;  %v2474_v15 = vsel %vm2472_vm6, %v5795_v58, %v5792_v5  ;;  %vm3501_vm2 = vcmp.lt.s32.totalorder %v3500_v61, 0  ;;  %vm5799_vm11 = vweird.f32 %v5798_v7  ;;  %v5812_v5 = vld [vmem:[#allocation22_spill] sm:$0xff]  ;;  %v5816_v7 = vld [vmem:[#allocation9_spill] sm:$0xff] }
 0x1a8   :  { %v2372_v13 = vsel %vm5799_vm11, nan, %v2371_v62  ;;  %v2475_v35 = vsel %vm2468_vm0, %v2471_v38, %v2474_v15  ;;  %v2778_v12 = vadd.s32 3, %v5800_v36  ;;  %v1700_v31 = vsel %vm3501_vm2, 0, %v3500_v61  ;;  %v5810_v61 = vld [vmem:[#allocation6_spill] sm:$0xff] }
 0x1a9   :  { %3418 = vst.msk [vmem:[%s5611_s2 + $0x28] sm:$0xff] %vm1732_vm13, %v2372_v13  ;;  %vm5802_vm9 = vweird.f32 %v5801_v34  ;;  %v2571_v3 = vand.u32 3, %v2570_v1  ;;  %v2675_v8 = vand.u32 3, %v2674_v14  ;;  %v1701_v47 = vsub.s32 32, %v1700_v31 }
 0x1aa   :  { %v2476_v43 = vsel %vm5802_vm9, nan, %v2475_v35  ;;  %v1702_v52 = vshll.u32 %v5379_v6, %v1700_v31  ;;  %v1705_v17 = vsub.s32 4294967266, %v1700_v31  ;;  %v2779_v20 = vand.u32 3, %v2778_v12  ;;  %v5806_v6 = vld [vmem:[#allocation19_spill] sm:$0xff]  ;;  %v5471_v42 = vpop.eup %3692  ;;  %v5818_v35 = vld [vmem:[#allocation25_spill] sm:$0xff]  ;;  %v5820_v12 = vld [vmem:[#allocation24_spill] sm:$0xff] }
 0x1ab   :  { %3419 = vst.msk [vmem:[%s5611_s2 + $0x30] sm:$0xff] %vm1732_vm13, %v2476_v43  ;;  %v5803_v63 = vand.u32 2147483647, %v5096_v24  ;;  %vm2572_vm7 = vcmp.lt.s32.totalorder %v2571_v3, 2  ;;  %vm2573_vm15 = vcmp.eq.s32.totalorder %v2571_v3, 0  ;;  %vm2576_vm0 = vcmp.eq.s32.totalorder %v2571_v3, 2  ;;  %v5473_v2 = vpop.eup %3694 }
 0x1ac   :  { %vm2676_vm1 = vcmp.lt.s32.totalorder %v2675_v8, 2  ;;  %v1703_v59 = vshrl.u32 %v1685_v46, %v1701_v47  ;;  %v1706_v56 = vadd.s32 127, %v1705_v17  ;;  %v5807_v40 = vxor.u32 2147483648, %v5806_v6  ;;  %v5822_v47 = vld [vmem:[#allocation26_spill] sm:$0xff] }
 0x1ad   :  { %vm5461_vm4 = vcmp.le.f32.partialorder %v5803_v63, 0.7853982  ;;  %v5809_v23 = vxor.u32 2147483648, %v5808_v22  ;;  %vm2677_vm6 = vcmp.eq.s32.totalorder %v2675_v8, 0  ;;  %vm2680_vm2 = vcmp.eq.s32.totalorder %v2675_v8, 2 }
 0x1ae   :  { %v2575_v53 = vsel %vm2573_vm15, %v5808_v22, %v5807_v40  ;;  %vm2780_vm11 = vcmp.lt.s32.totalorder %v2779_v20, 2  ;;  %v1625_v28 = vxor.u32 2147483648, %v5471_v42  ;;  %v1704_v46 = vor.u32 %v1703_v59, %v1702_v52  ;;  %v5823_v40 = vld [vmem:[#allocation12_spill] sm:$0xff] }
 0x1af   :  { %v2578_v54 = vsel %vm2576_vm0, %v5809_v23, %v5806_v6  ;;  %v1707_v4 = vshll.u32 %v1706_v56, 23  ;;  %vm5811_vm9 = vweird.f32 %v5810_v61  ;;  %v1622_v27 = vxor.u32 2147483648, %v5473_v2 }
 0x1b0   :  { %v2579_v26 = vsel %vm2572_vm7, %v2575_v53, %v2578_v54  ;;  %v5813_v11 = vxor.u32 2147483648, %v5812_v5  ;;  %v5815_v62 = vxor.u32 2147483648, %v5814_v29  ;;  %vm2781_vm7 = vcmp.eq.s32.totalorder %v2779_v20, 0 }
 0x1b1   :  { %v2580_v51 = vsel %vm5811_vm9, nan, %v2579_v26  ;;  %v1626_v15 = vsel %vm1624_vm8, %v1625_v28, %v5473_v2  ;;  %v1708_v32 = vor.u32 4788187, %v1707_v4  ;;  %v1711_v1 = vcvt.s32.f32 %v1704_v46 }
 0x1b2   :  { %3420 = vst.msk [vmem:[%s5611_s2 + $0x38] sm:$0xff] %vm1732_vm13, %v2580_v51  ;;  %v2679_v38 = vsel %vm2677_vm6, %v5814_v29, %v5813_v11  ;;  %v2682_v58 = vsel %vm2680_vm2, %v5815_v62, %v5812_v5  ;;  %v1623_v14 = vsel %vm1621_vm3, %v5471_v42, %v1622_v27  ;;  %vm5817_vm15 = vweird.f32 %v5816_v7  ;;  %v5828_v51 = vld [vmem:[#allocation27_spill] sm:$0xff]  ;;  %v5829_v29 = vld [vmem:[#allocation16_spill] sm:$0xff] }
 0x1b3   :  { %v2683_v49 = vsel %vm2676_vm1, %v2679_v38, %v2682_v58  ;;  %v5819_v36 = vxor.u32 2147483648, %v5818_v35  ;;  %vm2784_vm0 = vcmp.eq.s32.totalorder %v2779_v20, 2  ;;  %v1627_v34 = vsel %vm1620_vm12, %v1623_v14, %v1626_v15 }
 0x1b4   :  { %v2684_v13 = vsel %vm5817_vm15, nan, %v2683_v49  ;;  %v1709_v43 = vand.u32 2147483647, %v1708_v32  ;;  %v5821_v3 = vxor.u32 2147483648, %v5820_v12  ;;  %v2882_v52 = vadd.s32 3, %v5822_v47 }
 0x1b5   :  { %v2783_v31 = vsel %vm2781_vm7, %v5820_v12, %v5819_v36  ;;  %3421 = vst.msk [vmem:[%s5611_s2 + $0x40] sm:$0xff] %vm1732_vm13, %v2684_v13  ;;  %v1628_v17 = vsel %vm1618_vm10, nan, %v1627_v34  ;;  %v2986_v57 = vadd.s32 3, %v5020_v50  ;;  %v3090_v59 = vadd.s32 3, %v5086_v55 }
 0x1b6   :  { %v2786_v8 = vsel %vm2784_vm0, %v5821_v3, %v5818_v35  ;;  %1747 = vst.msk [vmem:[%s5610_s1 + $0x70] sm:$0xff] %vm1732_vm13, %v1628_v17  ;;  %v1712_v56 = vmul.f32 %v1711_v1, %v1709_v43  ;;  %v1718_v6 = vsel %vm5461_vm4, 0, %v5414_v48  ;;  %vm5824_vm8 = vweird.f32 %v5823_v40 }
 0x1b7   :  { %v2787_v63 = vsel %vm2780_vm11, %v2783_v31, %v2786_v8  ;;  %v2883_v53 = vand.u32 3, %v2882_v52  ;;  %v2987_v50 = vand.u32 3, %v2986_v57  ;;  %v3091_v55 = vand.u32 3, %v3090_v59 }
 0x1b8   :  { %v2788_v22 = vsel %vm5824_vm8, nan, %v2787_v63  ;;  %v3194_v20 = vadd.s32 3, %v5190_v60  ;;  %v3298_v23 = vadd.s32 3, %v5365_v0  ;;  %v1713_v54 = vxor.u32 2147483648, %v1712_v56 }
 0x1b9   :  { %3422 = vst.msk [vmem:[%s5611_s2 + $0x48] sm:$0xff] %vm1732_vm13, %v2788_v22  ;;  %vm2884_vm3 = vcmp.lt.s32.totalorder %v2883_v53, 2  ;;  %vm2885_vm12 = vcmp.eq.s32.totalorder %v2883_v53, 0  ;;  %vm2888_vm1 = vcmp.eq.s32.totalorder %v2883_v53, 2  ;;  %v5825_v48 = vxor.u32 2147483648, %v4957_v41 }
 0x1ba   :  { %v5826_v46 = vxor.u32 2147483648, %v4948_v37  ;;  %vm2988_vm6 = vcmp.lt.s32.totalorder %v2987_v50, 2  ;;  %vm2989_vm2 = vcmp.eq.s32.totalorder %v2987_v50, 0  ;;  %v1714_v61 = vsel %vm1631_vm5, %v1713_v54, %v1712_v56 }
 0x1bb   :  { %v2887_v26 = vsel %vm2885_vm12, %v4948_v37, %v5825_v48  ;;  %v5827_v0 = vxor.u32 2147483648, %v5055_v18  ;;  %vm2992_vm11 = vcmp.eq.s32.totalorder %v2987_v50, 2  ;;  %v1717_v11 = vsel %vm5461_vm4, %v5096_v24, %v1714_v61 }
 0x1bc   :  { %v2890_v4 = vsel %vm2888_vm1, %v5826_v46, %v4957_v41  ;;  %vm5830_vm9 = vweird.f32 %v5829_v29  ;;  %v5831_v37 = vxor.u32 2147483648, %v5828_v51  ;;  %vm3092_vm7 = vcmp.lt.s32.totalorder %v3091_v55, 2 }
 0x1bd   :  { %v2891_v60 = vsel %vm2884_vm3, %v2887_v26, %v2890_v4  ;;  %v2991_v5 = vsel %vm2989_vm2, %v5828_v51, %v5827_v0  ;;  %3696 = vcosq.f32 %v1717_v11  ;;  %vm3093_vm5 = vcmp.eq.s32.totalorder %v3091_v55, 0 }
 0x1be   :  { %v2892_v38 = vsel %vm5830_vm9, nan, %v2891_v60  ;;  %v2994_v41 = vsel %vm2992_vm11, %v5831_v37, %v5055_v18  ;;  %vm3096_vm15 = vcmp.eq.s32.totalorder %v3091_v55, 2  ;;  %3698 = vsinq.f32 %v1717_v11 }
 0x1bf   :  { %3423 = vst.msk [vmem:[%s5611_s2 + $0x50] sm:$0xff] %vm1732_vm13, %v2892_v38  ;;  %v2995_v62 = vsel %vm2988_vm6, %v2991_v5, %v2994_v41  ;;  %vm5833_vm4 = vweird.f32 %v5832_v10  ;;  %v3095_v15 = vsel %vm3093_vm5, %v5183_v21, %v1416_v45  ;;  %v5834_v18 = vxor.u32 2147483648, %v5183_v21 }
 0x1c0   :  { %v2996_v58 = vsel %vm5833_vm4, nan, %v2995_v62  ;;  %v3195_v49 = vand.u32 3, %v3194_v20  ;;  %v3299_v14 = vand.u32 3, %v3298_v23  ;;  %v3402_v7 = vadd.s32 3, %v1718_v6 }
 0x1c1   :  { %v3098_v32 = vsel %vm3096_vm15, %v5834_v18, %v5185_v33  ;;  %3424 = vst.msk [vmem:[%s5611_s2 + $0x58] sm:$0xff] %vm1732_vm13, %v2996_v58  ;;  %v1722_v13 = vand.u32 3, %v1718_v6  ;;  %vm5835_vm0 = vweird.f32 %v4831_v16  ;;  %vm1721_vm4 = vweird.f32 %v5096_v24 }
 0x1c2   :  { %v3099_v1 = vsel %vm3092_vm7, %v3095_v15, %v3098_v32  ;;  %vm3196_vm8 = vcmp.lt.s32.totalorder %v3195_v49, 2  ;;  %vm3197_vm3 = vcmp.eq.s32.totalorder %v3195_v49, 0  ;;  %vm3200_vm12 = vcmp.eq.s32.totalorder %v3195_v49, 2 }
 0x1c3   :  { %v3100_v35 = vsel %vm5835_vm0, nan, %v3099_v1  ;;  %vm3300_vm1 = vcmp.lt.s32.totalorder %v3299_v14, 2  ;;  %v3199_v21 = vsel %vm3197_vm3, %v5320_v30, %v1519_v9  ;;  %v3202_v33 = vsel %vm3200_vm12, %v1522_v39, %v5324_v25 }
 0x1c4   :  { %3425 = vst.msk [vmem:[%s5611_s2 + $0x60] sm:$0xff] %vm1732_vm13, %v3100_v35  ;;  %vm3301_vm6 = vcmp.eq.s32.totalorder %v3299_v14, 0  ;;  %vm3304_vm2 = vcmp.eq.s32.totalorder %v3299_v14, 2  ;;  %v3203_v16 = vsel %vm3196_vm8, %v3199_v21, %v3202_v33  ;;  %v3403_v12 = vand.u32 3, %v3402_v7 }
 0x1c5   :  { %v3303_v45 = vsel %vm3301_vm6, %v5471_v42, %v1622_v27  ;;  %v3306_v36 = vsel %vm3304_vm2, %v1625_v28, %v5473_v2  ;;  %v3204_v31 = vsel %vm1515_vm14, nan, %v3203_v16  ;;  %vm1727_vm11 = vcmp.eq.s32.totalorder %v1722_v13, 2 }
 0x1c6   :  { %v3307_v9 = vsel %vm3300_vm1, %v3303_v45, %v3306_v36  ;;  %3426 = vst.msk [vmem:[%s5611_s2 + $0x68] sm:$0xff] %vm1732_vm13, %v3204_v31  ;;  %vm3408_vm9 = vcmp.eq.s32.totalorder %v3403_v12, 2  ;;  %vm1724_vm7 = vcmp.eq.s32.totalorder %v1722_v13, 0  ;;  %vm3405_vm14 = vcmp.eq.s32.totalorder %v3403_v12, 0 }
 0x1c7   :  { %v3308_v30 = vsel %vm1618_vm10, nan, %v3307_v9  ;;  %v3697_v25 = vpop.eup %3696  ;;  %vm1723_vm5 = vcmp.lt.s32.totalorder %v1722_v13, 2  ;;  %vm3404_vm15 = vcmp.lt.s32.totalorder %v3403_v12, 2 }
 0x1c8   :  { %3427 = vst.msk [vmem:[%s5611_s2 + $0x70] sm:$0xff] %vm1732_vm13, %v3308_v30  ;;  %v3699_v39 = vpop.eup %3698  ;;  %v1728_v44 = vxor.u32 2147483648, %v3697_v25 }
 0x1c9   :  { %v1725_v42 = vxor.u32 2147483648, %v3699_v39 }
 0x1ca   :  { %v1729_v2 = vsel %vm1727_vm11, %v1728_v44, %v3699_v39  ;;  %v3410_v19 = vsel %vm3408_vm9, %v1728_v44, %v3699_v39 }
 0x1cb   :  { %v1726_v28 = vsel %vm1724_vm7, %v3697_v25, %v1725_v42  ;;  %v3407_v27 = vsel %vm3405_vm14, %v3697_v25, %v1725_v42 }
 0x1cc   :  { %v1730_v34 = vsel %vm1723_vm5, %v1726_v28, %v1729_v2  ;;  %v3411_v43 = vsel %vm3404_vm15, %v3407_v27, %v3410_v19 }
 0x1cd   :  { %v1731_v3 = vsel %vm1721_vm4, nan, %v1730_v34  ;;  %v3412_v8 = vsel %vm1721_vm4, nan, %v3411_v43 }
 0x1ce   :  { %1748 = vst.msk [vmem:[%s5610_s1 + $0x78] sm:$0xff] %vm1732_vm13, %v1731_v3  ;;  %3428 = vst.msk [vmem:[%s5611_s2 + $0x78] sm:$0xff] %vm1732_vm13, %v3412_v8 }

</bundles_post_ra>
